<compile_context>
chip_gen: v7x
topology: tpu7x:2x2x1
jax: 0.10.0
libtpu: 0.0.40
codegen_flags: <defaults>
</compile_context>

<pallas_src>
import numpy as np

import jax
import jax.numpy as jnp
from jax.experimental import pallas as pl
from jax.experimental.pallas import tpu as pltpu


# ---------------------------------------------------------------------------
# Fused forward kernel: conv1 -> conv2 -> flatten -> fc1 -> fc2, one pallas_call.
# ---------------------------------------------------------------------------
def _fused_forward_kernel(p_ref, w1_ref, b1_ref, m_ref, b2_ref,
                          fw1_ref, fb1_ref, fw2_ref, fb2_ref, out_ref):
    f32 = jnp.float32
    n_taps, _, _ = p_ref.shape          # (9, B, n1)
    c1n = m_ref.shape[0]                # conv1 output channels (4)
    n_flat = m_ref.shape[2]             # C2 * H2 * W2 = 384

    # Hoist the 9 conv1 im2col taps once; each is a small (B, 192) f32 tile.
    taps = [p_ref[t] for t in range(n_taps)]

    # conv2 output directly in torch.flatten order: (B, c2*48 + s) lanes.
    y2 = jnp.zeros((taps[0].shape[0], n_flat), f32)
    for c1 in range(c1n):
        # ---- conv1 channel c1 (+bias+ReLU): exact f32 VPU MACs --------------
        y1c = taps[0] * w1_ref[c1, 0]
        for t in range(1, n_taps):
            y1c = y1c + taps[t] * w1_ref[c1, t]
        y1c = jnp.maximum(y1c + b1_ref[c1], 0.0)
        # ---- conv2 + flatten: one lane-dense bf16 MXU matmul per channel ----
        # (gather pattern, conv2 weights and flatten order all pre-folded
        #  into the batch-independent matrix m_ref[c1]).
        y2 = y2 + jnp.dot(y1c.astype(jnp.bfloat16), m_ref[c1],
                          preferred_element_type=f32)
    y2 = jnp.maximum(y2 + b2_ref[...], 0.0)          # (B, 384)

    # ---- fc1 (+bias+ReLU) and fc2 (+bias): plain f32 matmuls ----------------
    h1 = jnp.maximum(jnp.dot(y2, fw1_ref[...], preferred_element_type=f32)
                     + fb1_ref[...], 0.0)            # (B, 8)
    out_ref[...] = (jnp.dot(h1, fw2_ref[...], preferred_element_type=f32)
                    + fb2_ref[...]).astype(out_ref.dtype)


# ---------------------------------------------------------------------------
# Per-call glue: stride-2/pad-1 im2col of the raw (B, 32, 24) input (~14 KiB).
# ---------------------------------------------------------------------------
def _conv_out(n):
    """Output size of a k=3, s=2, p=1 conv along one axis."""
    return (n - 1) // 2 + 1


def _conv1_patches(x):
    """x: (B, H, W) -> (9, B, H1*W1) with tap index t = dy*3 + dx."""
    B, H, W = x.shape
    Ho, Wo = _conv_out(H), _conv_out(W)
    xp = jnp.pad(x, ((0, 0), (1, 1), (1, 1)))
    taps = [xp[:, dy:dy + 2 * Ho - 1:2, dx:dx + 2 * Wo - 1:2]
            for dy in range(3) for dx in range(3)]          # each (B, Ho, Wo)
    return jnp.stack(taps, axis=0).reshape(9, B, Ho * Wo)
    # TODO(synk): fold this tiny XLA prologue into the kernel (pad into a VMEM
    # scratch + static strided taps) to save one dispatch for latency-bound
    # serving; kept outside for robustness of the stride-2 lane slicing.


def micro_temp_net_forward(x, packed):
    """x: (B, 32, 24) float32 -> logits (B, num_classes). One pallas_call."""
    B = x.shape[0]
    num_classes = packed["fc2_wt"].shape[1]
    p = _conv1_patches(x.astype(jnp.float32))        # (9, B, 192)

    vmem = pl.BlockSpec(memory_space=pltpu.MemorySpace.VMEM)
    smem = pl.BlockSpec(memory_space=pltpu.MemorySpace.SMEM)
    args = (p, packed["w1"], packed["b1"], packed["m"], packed["b2row"],
            packed["fc1_wt"], packed["fc1_b"], packed["fc2_wt"], packed["fc2_b"])
    in_specs = [vmem, smem, smem, vmem, vmem, vmem, vmem, vmem, vmem]
    return pl.pallas_call(
        _fused_forward_kernel,
        out_shape=jax.ShapeDtypeStruct((B, num_classes), jnp.float32),
        in_specs=in_specs,
        out_specs=vmem,
    )(*args)
    # TODO(synk): when B grows, add a leading batch grid axis with
    # dimension_semantics=("parallel",) so v7x's second TensorCore is used;
    # all packed operands are already batch-independent so this is a pure
    # BlockSpec change.


# ---------------------------------------------------------------------------
# One-time (hoisted, batch-independent) weight re-layout.
# ---------------------------------------------------------------------------
def pack_params(params, height=32, width=24):
    conv1_w = np.asarray(params["conv1_w"], np.float32)   # (C1, 1, 3, 3)
    conv1_b = np.asarray(params["conv1_b"], np.float32)   # (C1,)
    conv2_w = np.asarray(params["conv2_w"], np.float32)   # (C2, C1, 3, 3)
    conv2_b = np.asarray(params["conv2_b"], np.float32)   # (C2,)
    fc1_w = np.asarray(params["fc1_w"], np.float32)       # (F1, C2*n2)
    fc1_b = np.asarray(params["fc1_b"], np.float32)
    fc2_w = np.asarray(params["fc2_w"], np.float32)       # (NC, F1)
    fc2_b = np.asarray(params["fc2_b"], np.float32)

    c1n, c2n = conv1_w.shape[0], conv2_w.shape[0]
    H1, W1 = _conv_out(height), _conv_out(width)           # (16, 12)
    H2, W2 = _conv_out(H1), _conv_out(W1)                  # (8, 6)
    n1, n2 = H1 * W1, H2 * W2                               # 192, 48
    assert fc1_w.shape[1] == c2n * n2, "classifier in_features mismatch"

    # conv1: (C1, 9) tap table + bias, read as SMEM scalars inside the kernel.
    w1 = conv1_w.reshape(c1n, 9)
    b1 = conv1_b

    # conv2 gather + weights + torch.flatten ordering folded into one
    # batch-independent matrix per input channel:
    #   m[c1][s_in, c2*n2 + s_out] = sum_{dy,dx} w2[c2, c1, dy, dx] * sel
    # (out-of-range taps == zero padding contribute nothing).
    m = np.zeros((c1n, n1, c2n * n2), np.float32)
    cols_base = np.arange(c2n) * n2
    for h2 in range(H2):
        for w2i in range(W2):
            s_out = h2 * W2 + w2i
            for dy in range(3):
                hi = 2 * h2 + dy - 1
                if not 0 <= hi < H1:
                    continue
                for dx in range(3):
                    wi = 2 * w2i + dx - 1
                    if not 0 <= wi < W1:
                        continue
                    s_in = hi * W1 + wi
                    m[:, s_in, cols_base + s_out] += conv2_w[:, :, dy, dx].T
    b2row = np.repeat(conv2_b, n2).reshape(1, c2n * n2)     # (1, 384)

    # fc1 / fc2: the (B, c2*n2 + s) activation layout IS torch.flatten order,
    # so the original weights are used directly (just transposed).
    fw1 = np.ascontiguousarray(fc1_w.T)                      # (384, F1)
    fb1 = fc1_b.reshape(1, -1)
    fw2 = np.ascontiguousarray(fc2_w.T)                      # (F1, NC)
    fb2 = fc2_b.reshape(1, -1)

    return {
        "w1": jnp.asarray(w1, jnp.float32),
        "b1": jnp.asarray(b1, jnp.float32),
        "m": jnp.asarray(m, jnp.bfloat16),       # dominant operand -> bf16
        "b2row": jnp.asarray(b2row, jnp.float32),
        "fc1_wt": jnp.asarray(fw1, jnp.float32),
        "fc1_b": jnp.asarray(fb1, jnp.float32),
        "fc2_wt": jnp.asarray(fw2, jnp.float32),
        "fc2_b": jnp.asarray(fb2, jnp.float32),
    }


# ---------------------------------------------------------------------------
# Parameter init (matches PyTorch default uniform(-1/sqrt(fan_in), ...)).
# ---------------------------------------------------------------------------
def init_params(key, num_classes=5):
    ks = jax.random.split(key, 8)

    def u(k, shape, fan_in):
        bound = 1.0 / np.sqrt(fan_in)
        return jax.random.uniform(k, shape, jnp.float32, -bound, bound)

    return {
        "conv1_w": u(ks[0], (4, 1, 3, 3), 1 * 9),
        "conv1_b": u(ks[1], (4,), 1 * 9),
        "conv2_w": u(ks[2], (8, 4, 3, 3), 4 * 9),
        "conv2_b": u(ks[3], (8,), 4 * 9),
        "fc1_w": u(ks[4], (8, 8 * 8 * 6), 8 * 8 * 6),
        "fc1_b": u(ks[5], (8,), 8 * 8 * 6),
        "fc2_w": u(ks[6], (num_classes, 8), 8),
        "fc2_b": u(ks[7], (num_classes,), 8),
    }


# ---------------------------------------------------------------------------
# Pure-JAX (XLA) reference, identical math to the PyTorch module.
# ---------------------------------------------------------------------------
def reference_forward(x, params):
    hp = jax.lax.Precision.HIGHEST
    h = x[:, None, :, :].astype(jnp.float32)                 # (B, 1, 32, 24)
    for wk, bk in (("conv1_w", "conv1_b"), ("conv2_w", "conv2_b")):
        h = jax.lax.conv_general_dilated(
            h, params[wk], window_strides=(2, 2), padding=((1, 1), (1, 1)),
            dimension_numbers=("NCHW", "OIHW", "NCHW"), precision=hp)
        h = jax.nn.relu(h + params[bk][None, :, None, None])
    h = h.reshape(x.shape[0], -1)                            # torch.flatten(x, 1)
    h = jax.nn.relu(jnp.dot(h, params["fc1_w"].T, precision=hp) + params["fc1_b"])
    return jnp.dot(h, params["fc2_w"].T, precision=hp) + params["fc2_b"]


if __name__ == "__main__":
    key = jax.random.PRNGKey(0)
    k_x, k_p = jax.random.split(key)

    B = 2
    # Input spatial size implied by classifier in_features = 8*8*6:
    # (32, 24) -> conv s2 -> (16, 12) -> conv s2 -> (8, 6).
    x = jax.random.normal(k_x, (B, 32, 24), dtype=jnp.float32)
    params = init_params(k_p, num_classes=5)
    packed = pack_params(params)          # one-time, batch-independent

    fwd = jax.jit(micro_temp_net_forward)
    logits = jax.block_until_ready(fwd(x, packed))

    assert logits.shape == (B, 5), logits.shape
    assert logits.dtype == jnp.float32
    assert bool(jnp.all(jnp.isfinite(logits)))

    ref = jax.block_until_ready(reference_forward(x, params))
    max_err = float(jnp.max(jnp.abs(logits - ref)))
    # conv2 runs as a bf16 MXU matmul (f32 accumulation); 1e-2 tolerance vs.
    # the f32 HIGHEST-precision reference is intentional and holds with margin.
    assert bool(jnp.allclose(logits, ref, atol=1e-2, rtol=1e-2)), (
        f"mismatch vs reference, max abs err = {max_err}")

    print("KERNEL_OK")
</pallas_src>

<mosaic_0001>
module attributes {stable_mosaic.version = 11 : i64} {
  func.func @_fused_forward_kernel(%arg0: memref<9x2x192xf32, #tpu.memory_space<vmem>>, %arg1: memref<4x9xf32, #tpu.memory_space<smem>>, %arg2: memref<4xf32, #tpu.memory_space<smem>>, %arg3: memref<4x192x384xbf16, #tpu.memory_space<vmem>>, %arg4: memref<1x384xf32, #tpu.memory_space<vmem>>, %arg5: memref<384x8xf32, #tpu.memory_space<vmem>>, %arg6: memref<1x8xf32, #tpu.memory_space<vmem>>, %arg7: memref<8x5xf32, #tpu.memory_space<vmem>>, %arg8: memref<1x5xf32, #tpu.memory_space<vmem>>, %arg9: memref<2x5xf32, #tpu.memory_space<vmem>>) attributes {dimension_semantics = [], scalar_prefetch = 0 : i64, scratch_operands = 0 : i64, tpu.core_type = #tpu.core_type<tc>} {
    %c0 = arith.constant 0 : index
    %c0_0 = arith.constant 0 : index
    %c0_1 = arith.constant 0 : index
    %0 = vector.load %arg0[%c0, %c0_0, %c0_1] : memref<9x2x192xf32, #tpu.memory_space<vmem>>, vector<1x2x192xf32>
    %1 = vector.shape_cast %0 : vector<1x2x192xf32> to vector<2x192xf32>
    %c1 = arith.constant 1 : index
    %c0_2 = arith.constant 0 : index
    %c0_3 = arith.constant 0 : index
    %2 = vector.load %arg0[%c1, %c0_2, %c0_3] : memref<9x2x192xf32, #tpu.memory_space<vmem>>, vector<1x2x192xf32>
    %3 = vector.shape_cast %2 : vector<1x2x192xf32> to vector<2x192xf32>
    %c2 = arith.constant 2 : index
    %c0_4 = arith.constant 0 : index
    %c0_5 = arith.constant 0 : index
    %4 = vector.load %arg0[%c2, %c0_4, %c0_5] : memref<9x2x192xf32, #tpu.memory_space<vmem>>, vector<1x2x192xf32>
    %5 = vector.shape_cast %4 : vector<1x2x192xf32> to vector<2x192xf32>
    %c3 = arith.constant 3 : index
    %c0_6 = arith.constant 0 : index
    %c0_7 = arith.constant 0 : index
    %6 = vector.load %arg0[%c3, %c0_6, %c0_7] : memref<9x2x192xf32, #tpu.memory_space<vmem>>, vector<1x2x192xf32>
    %7 = vector.shape_cast %6 : vector<1x2x192xf32> to vector<2x192xf32>
    %c4 = arith.constant 4 : index
    %c0_8 = arith.constant 0 : index
    %c0_9 = arith.constant 0 : index
    %8 = vector.load %arg0[%c4, %c0_8, %c0_9] : memref<9x2x192xf32, #tpu.memory_space<vmem>>, vector<1x2x192xf32>
    %9 = vector.shape_cast %8 : vector<1x2x192xf32> to vector<2x192xf32>
    %c5 = arith.constant 5 : index
    %c0_10 = arith.constant 0 : index
    %c0_11 = arith.constant 0 : index
    %10 = vector.load %arg0[%c5, %c0_10, %c0_11] : memref<9x2x192xf32, #tpu.memory_space<vmem>>, vector<1x2x192xf32>
    %11 = vector.shape_cast %10 : vector<1x2x192xf32> to vector<2x192xf32>
    %c6 = arith.constant 6 : index
    %c0_12 = arith.constant 0 : index
    %c0_13 = arith.constant 0 : index
    %12 = vector.load %arg0[%c6, %c0_12, %c0_13] : memref<9x2x192xf32, #tpu.memory_space<vmem>>, vector<1x2x192xf32>
    %13 = vector.shape_cast %12 : vector<1x2x192xf32> to vector<2x192xf32>
    %c7 = arith.constant 7 : index
    %c0_14 = arith.constant 0 : index
    %c0_15 = arith.constant 0 : index
    %14 = vector.load %arg0[%c7, %c0_14, %c0_15] : memref<9x2x192xf32, #tpu.memory_space<vmem>>, vector<1x2x192xf32>
    %15 = vector.shape_cast %14 : vector<1x2x192xf32> to vector<2x192xf32>
    %c8 = arith.constant 8 : index
    %c0_16 = arith.constant 0 : index
    %c0_17 = arith.constant 0 : index
    %16 = vector.load %arg0[%c8, %c0_16, %c0_17] : memref<9x2x192xf32, #tpu.memory_space<vmem>>, vector<1x2x192xf32>
    %17 = vector.shape_cast %16 : vector<1x2x192xf32> to vector<2x192xf32>
    %cst = arith.constant 0.000000e+00 : f32
    %18 = vector.broadcast %cst : f32 to vector<2x384xf32>
    %c0_18 = arith.constant 0 : index
    %c0_19 = arith.constant 0 : index
    %19 = memref.load %arg1[%c0_18, %c0_19] : memref<4x9xf32, #tpu.memory_space<smem>>
    %20 = vector.broadcast %19 : f32 to vector<2x192xf32>
    %21 = arith.mulf %1, %20 : vector<2x192xf32>
    %c0_20 = arith.constant 0 : index
    %c1_21 = arith.constant 1 : index
    %22 = memref.load %arg1[%c0_20, %c1_21] : memref<4x9xf32, #tpu.memory_space<smem>>
    %23 = vector.broadcast %22 : f32 to vector<2x192xf32>
    %24 = arith.mulf %3, %23 : vector<2x192xf32>
    %25 = arith.addf %21, %24 : vector<2x192xf32>
    %c0_22 = arith.constant 0 : index
    %c2_23 = arith.constant 2 : index
    %26 = memref.load %arg1[%c0_22, %c2_23] : memref<4x9xf32, #tpu.memory_space<smem>>
    %27 = vector.broadcast %26 : f32 to vector<2x192xf32>
    %28 = arith.mulf %5, %27 : vector<2x192xf32>
    %29 = arith.addf %25, %28 : vector<2x192xf32>
    %c0_24 = arith.constant 0 : index
    %c3_25 = arith.constant 3 : index
    %30 = memref.load %arg1[%c0_24, %c3_25] : memref<4x9xf32, #tpu.memory_space<smem>>
    %31 = vector.broadcast %30 : f32 to vector<2x192xf32>
    %32 = arith.mulf %7, %31 : vector<2x192xf32>
    %33 = arith.addf %29, %32 : vector<2x192xf32>
    %c0_26 = arith.constant 0 : index
    %c4_27 = arith.constant 4 : index
    %34 = memref.load %arg1[%c0_26, %c4_27] : memref<4x9xf32, #tpu.memory_space<smem>>
    %35 = vector.broadcast %34 : f32 to vector<2x192xf32>
    %36 = arith.mulf %9, %35 : vector<2x192xf32>
    %37 = arith.addf %33, %36 : vector<2x192xf32>
    %c0_28 = arith.constant 0 : index
    %c5_29 = arith.constant 5 : index
    %38 = memref.load %arg1[%c0_28, %c5_29] : memref<4x9xf32, #tpu.memory_space<smem>>
    %39 = vector.broadcast %38 : f32 to vector<2x192xf32>
    %40 = arith.mulf %11, %39 : vector<2x192xf32>
    %41 = arith.addf %37, %40 : vector<2x192xf32>
    %c0_30 = arith.constant 0 : index
    %c6_31 = arith.constant 6 : index
    %42 = memref.load %arg1[%c0_30, %c6_31] : memref<4x9xf32, #tpu.memory_space<smem>>
    %43 = vector.broadcast %42 : f32 to vector<2x192xf32>
    %44 = arith.mulf %13, %43 : vector<2x192xf32>
    %45 = arith.addf %41, %44 : vector<2x192xf32>
    %c0_32 = arith.constant 0 : index
    %c7_33 = arith.constant 7 : index
    %46 = memref.load %arg1[%c0_32, %c7_33] : memref<4x9xf32, #tpu.memory_space<smem>>
    %47 = vector.broadcast %46 : f32 to vector<2x192xf32>
    %48 = arith.mulf %15, %47 : vector<2x192xf32>
    %49 = arith.addf %45, %48 : vector<2x192xf32>
    %c0_34 = arith.constant 0 : index
    %c8_35 = arith.constant 8 : index
    %50 = memref.load %arg1[%c0_34, %c8_35] : memref<4x9xf32, #tpu.memory_space<smem>>
    %51 = vector.broadcast %50 : f32 to vector<2x192xf32>
    %52 = arith.mulf %17, %51 : vector<2x192xf32>
    %53 = arith.addf %49, %52 : vector<2x192xf32>
    %c0_36 = arith.constant 0 : index
    %54 = memref.load %arg2[%c0_36] : memref<4xf32, #tpu.memory_space<smem>>
    %55 = vector.broadcast %54 : f32 to vector<2x192xf32>
    %56 = arith.addf %53, %55 : vector<2x192xf32>
    %cst_37 = arith.constant 0.000000e+00 : f32
    %57 = vector.broadcast %cst_37 : f32 to vector<2x192xf32>
    %58 = arith.maximumf %56, %57 : vector<2x192xf32>
    %59 = arith.truncf %58 : vector<2x192xf32> to vector<2x192xbf16>
    %c0_38 = arith.constant 0 : index
    %c0_39 = arith.constant 0 : index
    %c0_40 = arith.constant 0 : index
    %60 = vector.load %arg3[%c0_38, %c0_39, %c0_40] : memref<4x192x384xbf16, #tpu.memory_space<vmem>>, vector<1x192x384xbf16>
    %61 = vector.shape_cast %60 : vector<1x192x384xbf16> to vector<192x384xbf16>
    %cst_41 = arith.constant dense<0.000000e+00> : vector<2x384xf32>
    %62 = tpu.matmul %59, %61, %cst_41 {dimension_numbers = #tpu.dot_dimension_numbers<[1], [0], [0], [1], [0, 0, 1, 1], [], []>} : vector<2x192xbf16>, vector<192x384xbf16>, vector<2x384xf32> -> vector<2x384xf32>
    %63 = arith.addf %18, %62 : vector<2x384xf32>
    %c1_42 = arith.constant 1 : index
    %c0_43 = arith.constant 0 : index
    %64 = memref.load %arg1[%c1_42, %c0_43] : memref<4x9xf32, #tpu.memory_space<smem>>
    %65 = vector.broadcast %64 : f32 to vector<2x192xf32>
    %66 = arith.mulf %1, %65 : vector<2x192xf32>
    %c1_44 = arith.constant 1 : index
    %c1_45 = arith.constant 1 : index
    %67 = memref.load %arg1[%c1_44, %c1_45] : memref<4x9xf32, #tpu.memory_space<smem>>
    %68 = vector.broadcast %67 : f32 to vector<2x192xf32>
    %69 = arith.mulf %3, %68 : vector<2x192xf32>
    %70 = arith.addf %66, %69 : vector<2x192xf32>
    %c1_46 = arith.constant 1 : index
    %c2_47 = arith.constant 2 : index
    %71 = memref.load %arg1[%c1_46, %c2_47] : memref<4x9xf32, #tpu.memory_space<smem>>
    %72 = vector.broadcast %71 : f32 to vector<2x192xf32>
    %73 = arith.mulf %5, %72 : vector<2x192xf32>
    %74 = arith.addf %70, %73 : vector<2x192xf32>
    %c1_48 = arith.constant 1 : index
    %c3_49 = arith.constant 3 : index
    %75 = memref.load %arg1[%c1_48, %c3_49] : memref<4x9xf32, #tpu.memory_space<smem>>
    %76 = vector.broadcast %75 : f32 to vector<2x192xf32>
    %77 = arith.mulf %7, %76 : vector<2x192xf32>
    %78 = arith.addf %74, %77 : vector<2x192xf32>
    %c1_50 = arith.constant 1 : index
    %c4_51 = arith.constant 4 : index
    %79 = memref.load %arg1[%c1_50, %c4_51] : memref<4x9xf32, #tpu.memory_space<smem>>
    %80 = vector.broadcast %79 : f32 to vector<2x192xf32>
    %81 = arith.mulf %9, %80 : vector<2x192xf32>
    %82 = arith.addf %78, %81 : vector<2x192xf32>
    %c1_52 = arith.constant 1 : index
    %c5_53 = arith.constant 5 : index
    %83 = memref.load %arg1[%c1_52, %c5_53] : memref<4x9xf32, #tpu.memory_space<smem>>
    %84 = vector.broadcast %83 : f32 to vector<2x192xf32>
    %85 = arith.mulf %11, %84 : vector<2x192xf32>
    %86 = arith.addf %82, %85 : vector<2x192xf32>
    %c1_54 = arith.constant 1 : index
    %c6_55 = arith.constant 6 : index
    %87 = memref.load %arg1[%c1_54, %c6_55] : memref<4x9xf32, #tpu.memory_space<smem>>
    %88 = vector.broadcast %87 : f32 to vector<2x192xf32>
    %89 = arith.mulf %13, %88 : vector<2x192xf32>
    %90 = arith.addf %86, %89 : vector<2x192xf32>
    %c1_56 = arith.constant 1 : index
    %c7_57 = arith.constant 7 : index
    %91 = memref.load %arg1[%c1_56, %c7_57] : memref<4x9xf32, #tpu.memory_space<smem>>
    %92 = vector.broadcast %91 : f32 to vector<2x192xf32>
    %93 = arith.mulf %15, %92 : vector<2x192xf32>
    %94 = arith.addf %90, %93 : vector<2x192xf32>
    %c1_58 = arith.constant 1 : index
    %c8_59 = arith.constant 8 : index
    %95 = memref.load %arg1[%c1_58, %c8_59] : memref<4x9xf32, #tpu.memory_space<smem>>
    %96 = vector.broadcast %95 : f32 to vector<2x192xf32>
    %97 = arith.mulf %17, %96 : vector<2x192xf32>
    %98 = arith.addf %94, %97 : vector<2x192xf32>
    %c1_60 = arith.constant 1 : index
    %99 = memref.load %arg2[%c1_60] : memref<4xf32, #tpu.memory_space<smem>>
    %100 = vector.broadcast %99 : f32 to vector<2x192xf32>
    %101 = arith.addf %98, %100 : vector<2x192xf32>
    %cst_61 = arith.constant 0.000000e+00 : f32
    %102 = vector.broadcast %cst_61 : f32 to vector<2x192xf32>
    %103 = arith.maximumf %101, %102 : vector<2x192xf32>
    %104 = arith.truncf %103 : vector<2x192xf32> to vector<2x192xbf16>
    %c1_62 = arith.constant 1 : index
    %c0_63 = arith.constant 0 : index
    %c0_64 = arith.constant 0 : index
    %105 = vector.load %arg3[%c1_62, %c0_63, %c0_64] : memref<4x192x384xbf16, #tpu.memory_space<vmem>>, vector<1x192x384xbf16>
    %106 = vector.shape_cast %105 : vector<1x192x384xbf16> to vector<192x384xbf16>
    %cst_65 = arith.constant dense<0.000000e+00> : vector<2x384xf32>
    %107 = tpu.matmul %104, %106, %cst_65 {dimension_numbers = #tpu.dot_dimension_numbers<[1], [0], [0], [1], [0, 0, 1, 1], [], []>} : vector<2x192xbf16>, vector<192x384xbf16>, vector<2x384xf32> -> vector<2x384xf32>
    %108 = arith.addf %63, %107 : vector<2x384xf32>
    %c2_66 = arith.constant 2 : index
    %c0_67 = arith.constant 0 : index
    %109 = memref.load %arg1[%c2_66, %c0_67] : memref<4x9xf32, #tpu.memory_space<smem>>
    %110 = vector.broadcast %109 : f32 to vector<2x192xf32>
    %111 = arith.mulf %1, %110 : vector<2x192xf32>
    %c2_68 = arith.constant 2 : index
    %c1_69 = arith.constant 1 : index
    %112 = memref.load %arg1[%c2_68, %c1_69] : memref<4x9xf32, #tpu.memory_space<smem>>
    %113 = vector.broadcast %112 : f32 to vector<2x192xf32>
    %114 = arith.mulf %3, %113 : vector<2x192xf32>
    %115 = arith.addf %111, %114 : vector<2x192xf32>
    %c2_70 = arith.constant 2 : index
    %c2_71 = arith.constant 2 : index
    %116 = memref.load %arg1[%c2_70, %c2_71] : memref<4x9xf32, #tpu.memory_space<smem>>
    %117 = vector.broadcast %116 : f32 to vector<2x192xf32>
    %118 = arith.mulf %5, %117 : vector<2x192xf32>
    %119 = arith.addf %115, %118 : vector<2x192xf32>
    %c2_72 = arith.constant 2 : index
    %c3_73 = arith.constant 3 : index
    %120 = memref.load %arg1[%c2_72, %c3_73] : memref<4x9xf32, #tpu.memory_space<smem>>
    %121 = vector.broadcast %120 : f32 to vector<2x192xf32>
    %122 = arith.mulf %7, %121 : vector<2x192xf32>
    %123 = arith.addf %119, %122 : vector<2x192xf32>
    %c2_74 = arith.constant 2 : index
    %c4_75 = arith.constant 4 : index
    %124 = memref.load %arg1[%c2_74, %c4_75] : memref<4x9xf32, #tpu.memory_space<smem>>
    %125 = vector.broadcast %124 : f32 to vector<2x192xf32>
    %126 = arith.mulf %9, %125 : vector<2x192xf32>
    %127 = arith.addf %123, %126 : vector<2x192xf32>
    %c2_76 = arith.constant 2 : index
    %c5_77 = arith.constant 5 : index
    %128 = memref.load %arg1[%c2_76, %c5_77] : memref<4x9xf32, #tpu.memory_space<smem>>
    %129 = vector.broadcast %128 : f32 to vector<2x192xf32>
    %130 = arith.mulf %11, %129 : vector<2x192xf32>
    %131 = arith.addf %127, %130 : vector<2x192xf32>
    %c2_78 = arith.constant 2 : index
    %c6_79 = arith.constant 6 : index
    %132 = memref.load %arg1[%c2_78, %c6_79] : memref<4x9xf32, #tpu.memory_space<smem>>
    %133 = vector.broadcast %132 : f32 to vector<2x192xf32>
    %134 = arith.mulf %13, %133 : vector<2x192xf32>
    %135 = arith.addf %131, %134 : vector<2x192xf32>
    %c2_80 = arith.constant 2 : index
    %c7_81 = arith.constant 7 : index
    %136 = memref.load %arg1[%c2_80, %c7_81] : memref<4x9xf32, #tpu.memory_space<smem>>
    %137 = vector.broadcast %136 : f32 to vector<2x192xf32>
    %138 = arith.mulf %15, %137 : vector<2x192xf32>
    %139 = arith.addf %135, %138 : vector<2x192xf32>
    %c2_82 = arith.constant 2 : index
    %c8_83 = arith.constant 8 : index
    %140 = memref.load %arg1[%c2_82, %c8_83] : memref<4x9xf32, #tpu.memory_space<smem>>
    %141 = vector.broadcast %140 : f32 to vector<2x192xf32>
    %142 = arith.mulf %17, %141 : vector<2x192xf32>
    %143 = arith.addf %139, %142 : vector<2x192xf32>
    %c2_84 = arith.constant 2 : index
    %144 = memref.load %arg2[%c2_84] : memref<4xf32, #tpu.memory_space<smem>>
    %145 = vector.broadcast %144 : f32 to vector<2x192xf32>
    %146 = arith.addf %143, %145 : vector<2x192xf32>
    %cst_85 = arith.constant 0.000000e+00 : f32
    %147 = vector.broadcast %cst_85 : f32 to vector<2x192xf32>
    %148 = arith.maximumf %146, %147 : vector<2x192xf32>
    %149 = arith.truncf %148 : vector<2x192xf32> to vector<2x192xbf16>
    %c2_86 = arith.constant 2 : index
    %c0_87 = arith.constant 0 : index
    %c0_88 = arith.constant 0 : index
    %150 = vector.load %arg3[%c2_86, %c0_87, %c0_88] : memref<4x192x384xbf16, #tpu.memory_space<vmem>>, vector<1x192x384xbf16>
    %151 = vector.shape_cast %150 : vector<1x192x384xbf16> to vector<192x384xbf16>
    %cst_89 = arith.constant dense<0.000000e+00> : vector<2x384xf32>
    %152 = tpu.matmul %149, %151, %cst_89 {dimension_numbers = #tpu.dot_dimension_numbers<[1], [0], [0], [1], [0, 0, 1, 1], [], []>} : vector<2x192xbf16>, vector<192x384xbf16>, vector<2x384xf32> -> vector<2x384xf32>
    %153 = arith.addf %108, %152 : vector<2x384xf32>
    %c3_90 = arith.constant 3 : index
    %c0_91 = arith.constant 0 : index
    %154 = memref.load %arg1[%c3_90, %c0_91] : memref<4x9xf32, #tpu.memory_space<smem>>
    %155 = vector.broadcast %154 : f32 to vector<2x192xf32>
    %156 = arith.mulf %1, %155 : vector<2x192xf32>
    %c3_92 = arith.constant 3 : index
    %c1_93 = arith.constant 1 : index
    %157 = memref.load %arg1[%c3_92, %c1_93] : memref<4x9xf32, #tpu.memory_space<smem>>
    %158 = vector.broadcast %157 : f32 to vector<2x192xf32>
    %159 = arith.mulf %3, %158 : vector<2x192xf32>
    %160 = arith.addf %156, %159 : vector<2x192xf32>
    %c3_94 = arith.constant 3 : index
    %c2_95 = arith.constant 2 : index
    %161 = memref.load %arg1[%c3_94, %c2_95] : memref<4x9xf32, #tpu.memory_space<smem>>
    %162 = vector.broadcast %161 : f32 to vector<2x192xf32>
    %163 = arith.mulf %5, %162 : vector<2x192xf32>
    %164 = arith.addf %160, %163 : vector<2x192xf32>
    %c3_96 = arith.constant 3 : index
    %c3_97 = arith.constant 3 : index
    %165 = memref.load %arg1[%c3_96, %c3_97] : memref<4x9xf32, #tpu.memory_space<smem>>
    %166 = vector.broadcast %165 : f32 to vector<2x192xf32>
    %167 = arith.mulf %7, %166 : vector<2x192xf32>
    %168 = arith.addf %164, %167 : vector<2x192xf32>
    %c3_98 = arith.constant 3 : index
    %c4_99 = arith.constant 4 : index
    %169 = memref.load %arg1[%c3_98, %c4_99] : memref<4x9xf32, #tpu.memory_space<smem>>
    %170 = vector.broadcast %169 : f32 to vector<2x192xf32>
    %171 = arith.mulf %9, %170 : vector<2x192xf32>
    %172 = arith.addf %168, %171 : vector<2x192xf32>
    %c3_100 = arith.constant 3 : index
    %c5_101 = arith.constant 5 : index
    %173 = memref.load %arg1[%c3_100, %c5_101] : memref<4x9xf32, #tpu.memory_space<smem>>
    %174 = vector.broadcast %173 : f32 to vector<2x192xf32>
    %175 = arith.mulf %11, %174 : vector<2x192xf32>
    %176 = arith.addf %172, %175 : vector<2x192xf32>
    %c3_102 = arith.constant 3 : index
    %c6_103 = arith.constant 6 : index
    %177 = memref.load %arg1[%c3_102, %c6_103] : memref<4x9xf32, #tpu.memory_space<smem>>
    %178 = vector.broadcast %177 : f32 to vector<2x192xf32>
    %179 = arith.mulf %13, %178 : vector<2x192xf32>
    %180 = arith.addf %176, %179 : vector<2x192xf32>
    %c3_104 = arith.constant 3 : index
    %c7_105 = arith.constant 7 : index
    %181 = memref.load %arg1[%c3_104, %c7_105] : memref<4x9xf32, #tpu.memory_space<smem>>
    %182 = vector.broadcast %181 : f32 to vector<2x192xf32>
    %183 = arith.mulf %15, %182 : vector<2x192xf32>
    %184 = arith.addf %180, %183 : vector<2x192xf32>
    %c3_106 = arith.constant 3 : index
    %c8_107 = arith.constant 8 : index
    %185 = memref.load %arg1[%c3_106, %c8_107] : memref<4x9xf32, #tpu.memory_space<smem>>
    %186 = vector.broadcast %185 : f32 to vector<2x192xf32>
    %187 = arith.mulf %17, %186 : vector<2x192xf32>
    %188 = arith.addf %184, %187 : vector<2x192xf32>
    %c3_108 = arith.constant 3 : index
    %189 = memref.load %arg2[%c3_108] : memref<4xf32, #tpu.memory_space<smem>>
    %190 = vector.broadcast %189 : f32 to vector<2x192xf32>
    %191 = arith.addf %188, %190 : vector<2x192xf32>
    %cst_109 = arith.constant 0.000000e+00 : f32
    %192 = vector.broadcast %cst_109 : f32 to vector<2x192xf32>
    %193 = arith.maximumf %191, %192 : vector<2x192xf32>
    %194 = arith.truncf %193 : vector<2x192xf32> to vector<2x192xbf16>
    %c3_110 = arith.constant 3 : index
    %c0_111 = arith.constant 0 : index
    %c0_112 = arith.constant 0 : index
    %195 = vector.load %arg3[%c3_110, %c0_111, %c0_112] : memref<4x192x384xbf16, #tpu.memory_space<vmem>>, vector<1x192x384xbf16>
    %196 = vector.shape_cast %195 : vector<1x192x384xbf16> to vector<192x384xbf16>
    %cst_113 = arith.constant dense<0.000000e+00> : vector<2x384xf32>
    %197 = tpu.matmul %194, %196, %cst_113 {dimension_numbers = #tpu.dot_dimension_numbers<[1], [0], [0], [1], [0, 0, 1, 1], [], []>} : vector<2x192xbf16>, vector<192x384xbf16>, vector<2x384xf32> -> vector<2x384xf32>
    %198 = arith.addf %153, %197 : vector<2x384xf32>
    %c0_114 = arith.constant 0 : index
    %c0_115 = arith.constant 0 : index
    %199 = vector.load %arg4[%c0_114, %c0_115] : memref<1x384xf32, #tpu.memory_space<vmem>>, vector<1x384xf32>
    %200 = vector.broadcast %199 : vector<1x384xf32> to vector<2x384xf32>
    %201 = arith.addf %198, %200 : vector<2x384xf32>
    %cst_116 = arith.constant 0.000000e+00 : f32
    %202 = vector.broadcast %cst_116 : f32 to vector<2x384xf32>
    %203 = arith.maximumf %201, %202 : vector<2x384xf32>
    %c0_117 = arith.constant 0 : index
    %c0_118 = arith.constant 0 : index
    %204 = vector.load %arg5[%c0_117, %c0_118] : memref<384x8xf32, #tpu.memory_space<vmem>>, vector<384x8xf32>
    %cst_119 = arith.constant dense<0.000000e+00> : vector<2x8xf32>
    %205 = tpu.matmul %203, %204, %cst_119 {dimension_numbers = #tpu.dot_dimension_numbers<[1], [0], [0], [1], [0, 0, 1, 1], [], []>} : vector<2x384xf32>, vector<384x8xf32>, vector<2x8xf32> -> vector<2x8xf32>
    %c0_120 = arith.constant 0 : index
    %c0_121 = arith.constant 0 : index
    %206 = vector.load %arg6[%c0_120, %c0_121] : memref<1x8xf32, #tpu.memory_space<vmem>>, vector<1x8xf32>
    %207 = vector.broadcast %206 : vector<1x8xf32> to vector<2x8xf32>
    %208 = arith.addf %205, %207 : vector<2x8xf32>
    %cst_122 = arith.constant 0.000000e+00 : f32
    %209 = vector.broadcast %cst_122 : f32 to vector<2x8xf32>
    %210 = arith.maximumf %208, %209 : vector<2x8xf32>
    %c0_123 = arith.constant 0 : index
    %c0_124 = arith.constant 0 : index
    %211 = vector.load %arg7[%c0_123, %c0_124] : memref<8x5xf32, #tpu.memory_space<vmem>>, vector<8x5xf32>
    %cst_125 = arith.constant dense<0.000000e+00> : vector<2x5xf32>
    %212 = tpu.matmul %210, %211, %cst_125 {dimension_numbers = #tpu.dot_dimension_numbers<[1], [0], [0], [1], [0, 0, 1, 1], [], []>} : vector<2x8xf32>, vector<8x5xf32>, vector<2x5xf32> -> vector<2x5xf32>
    %c0_126 = arith.constant 0 : index
    %c0_127 = arith.constant 0 : index
    %213 = vector.load %arg8[%c0_126, %c0_127] : memref<1x5xf32, #tpu.memory_space<vmem>>, vector<1x5xf32>
    %214 = vector.broadcast %213 : vector<1x5xf32> to vector<2x5xf32>
    %215 = arith.addf %212, %214 : vector<2x5xf32>
    %c0_128 = arith.constant 0 : index
    %c0_129 = arith.constant 0 : index
    %216 = vector.load %arg9[%c0_128, %c0_129] : memref<2x5xf32, #tpu.memory_space<vmem>>, vector<2x5xf32>
    tpu.vector_store %arg9[%c0_128, %c0_129], %215 {strides = array<i32>} : memref<2x5xf32, #tpu.memory_space<vmem>>, vector<2x5xf32>,
    return
  }
}

</mosaic_0001>

<bundles_post_ra>
// kernel: micro_temp_net_forward.1
= control target key start
LH: loop header
LB: loop body
LE: loop exit
PB: predicated region body
PF: predicated region fallthrough
CT: control target
= control target key end

     0   :  { %14 = vsyncpa [#allocation4], 0  ;;  %s3557_s0 = inlined_call_operand.vmem [shape: f32[9,2,192], index: 0, kind: input, shape index: {}]   ;;  %s3558_s1 = inlined_call_operand.vmem [shape: f32[4,9], index: 1, kind: input, shape index: {}]   ;;  %s3559_s2 = inlined_call_operand.vmem [shape: f32[4], index: 2, kind: input, shape index: {}]   ;;  %s3560_s3 = inlined_call_operand.vmem [shape: bf16[4,192,384], index: 3, kind: input, shape index: {}]   ;;  %s3561_s4 = inlined_call_operand.vmem [shape: f32[1,384], index: 4, kind: input, shape index: {}]   ;;  %s3562_s5 = inlined_call_operand.vmem [shape: f32[384,8], index: 5, kind: input, shape index: {}]   ;;  %s3563_s6 = inlined_call_operand.vmem [shape: f32[1,8], index: 6, kind: input, shape index: {}]   ;;  %s3564_s7 = inlined_call_operand.vmem [shape: f32[8,5], index: 7, kind: input, shape index: {}]   ;;  %s3565_s8 = inlined_call_operand.vmem [shape: f32[1,5], index: 8, kind: input, shape index: {}]   ;;  %s3566_s9 = inlined_call_operand.hbm [shape: f32[2,5], index: 9, kind: output, shape index: {}]  }
   0x1   :  { %15 = vsyncpa [#allocation6], 0 }
   0x2   :  { %16 = vsyncpa [#allocation3], 0  ;;  %s25_s11 = sshll.u32 %s3558_s1, 4  ;;  %s35_s14 = sshll.u32 %s3559_s2, 4  ;;  %s26_s11 = int_to_ptr.vmem [resolvable:$true] %s25_s11  ;;  %s36_s14 = int_to_ptr.vmem [resolvable:$true] %s35_s14 }
   0x3   :  { %s2604_s15 = scalar_lea.vmem %s26_s11, 64  ;;  %p2609_p1 = scmp.lt.s32.totalorder %s26_s11, %s26_s11 }
   0x4   :  { %p2605_p0 = scmp.ne.s32.totalorder %s26_s11, %s2604_s15  ;;  %p2610_p2 = scmp.lt.s32.totalorder %s2604_s15, %s2604_s15 }
   0x6   :  { %p2611_p3 = por %p2610_p2, %p2609_p1 }
   0x8   :  { %p2612_p4 = pnand %p2611_p3, %p2605_p0 }
   0xa   :  { %2615 = shalt.err (!%p2612_p4)
}
   0xb   :  { %s2656_s16 = smov [#allocation2]   ;;  %s2616_s17 = scalar_lea.vmem %s36_s14, 16 }
   0xc   :  { %28 = dma.vmem_to_smem %s26_s11, 64, %s2656_s16, [#allocation4]  }
   0xd   :  { %p2617_p5 = scmp.ne.s32.totalorder %s36_s14, %s2616_s17  ;;  %p2621_p6 = scmp.lt.s32.totalorder %s36_s14, %s36_s14 }
   0xe   :  { %p2622_p7 = scmp.lt.s32.totalorder %s2616_s17, %s2616_s17 }
  0x10   :  { %p2623_p8 = por %p2622_p7, %p2621_p6 }
  0x12   :  { %p2624_p9 = pnand %p2623_p8, %p2617_p5 }
  0x14   :  { %2627 = shalt.err (!%p2624_p9)
}
  0x15   :  { %s2657_s1 = smov [#allocation5]  }
  0x16   :  { %38 = dma.vmem_to_smem %s36_s14, 16, %s2657_s1, [#allocation6]  }
  0x17   :  { %2650 = dma.done.wait [#allocation4], 64  }
  0x18   :  { %2651 = vsyncadd [#allocation4], 4294967232 }
  0x19   :  { %2652 = dma.done.wait [#allocation6], 16  }
  0x1a   :  { %2653 = vsyncadd [#allocation6], 4294967280 }
  0x1b   :  { %57 = sfence }
  0x1c   :  { %v2412_v0 = vld [vmem:[%s3560_s3 + $0x124] ss:$12 sps:$4 sm:$0xff]   ;;  %v2658_v1 = vmov 0   ;;  %v2414_v2 = vld [vmem:[%s3560_s3 + $0x128] ss:$12 sps:$4 sm:$0xff]   ;;  %s2763_s20 = sld [smem:[#allocation2 + $0x80]]  ;;  %v119_v54 = vlaneseq }
  0x1d   :  { %514 = vmatprep.subr.bf16.mxu1 %v2658_v1  ;;  %473 = vmatprep.subr.bf16.mxu0 %v2412_v0  ;;  %v2415_v3 = vld [vmem:[%s3560_s3 + $0x120] ss:$12 sps:$4 sm:$0xff]   ;;  %v2416_v4 = vld [vmem:[%s3560_s3 + $0x13c] ss:$12 sps:$4 sm:$0xff]   ;;  %v2419_v6 = vld [vmem:[%s3560_s3 + $0x138] ss:$12 sps:$4 sm:$0xff]  }
  0x1e   :  { %515 = vmatpush1.bf16.msra.mxu1 %v2414_v2  ;;  %474 = vmatpush1.bf16.msra.mxu0 %v2415_v3  ;;  %v2418_v5 = vld [vmem:[%s3560_s3 + $0x140] ss:$12 sps:$4 sm:$0xff]   ;;  %v2422_v8 = vld [vmem:[%s3560_s3 + $0x158] ss:$12 sps:$4 sm:$0xff]   ;;  %v2423_v9 = vld [vmem:[%s3560_s3 + $0x150] ss:$12 sps:$4 sm:$0xff]  }
  0x1f   :  { %516 = vmatprep.subr.bf16.mxu1 %v2658_v1  ;;  %475 = vmatprep.subr.bf16.mxu0 %v2416_v4  ;;  %v2420_v7 = vld [vmem:[%s3560_s3 + $0x154] ss:$12 sps:$4 sm:$0xff]   ;;  %v2424_v10 = vld [vmem:[%s3560_s3 + $0x16c] ss:$12 sps:$4 sm:$0xff]   ;;  %v2426_v11 = vld [vmem:[%s3560_s3 + $0x170] ss:$12 sps:$4 sm:$0xff]  }
  0x20   :  { %v2427_v12 = vld [vmem:[%s3560_s3 + $0x168] ss:$12 sps:$4 sm:$0xff]   ;;  %v2428_v13 = vld [vmem:[%s3560_s3 + $0x184] ss:$12 sps:$4 sm:$0xff]   ;;  %v2431_v15 = vld [vmem:[%s3560_s3 + $0x180] ss:$12 sps:$4 sm:$0xff]  }
  0x21   :  { %v2430_v14 = vld [vmem:[%s3560_s3 + $0x188] ss:$12 sps:$4 sm:$0xff]   ;;  %s2772_s25 = sld [smem:[#allocation2 + $0x81]]  ;;  %v2434_v17 = vld [vmem:[%s3560_s3 + $0x1a0] ss:$12 sps:$4 sm:$0xff]   ;;  %s2780_s30 = sld [smem:[#allocation2 + $0x82]] }
  0x22   :  { %517 = vmatpush1.bf16.msra.mxu1 %v2418_v5  ;;  %476 = vmatpush1.bf16.msra.mxu0 %v2419_v6  ;;  %v2432_v16 = vld [vmem:[%s3560_s3 + $0x19c] ss:$12 sps:$4 sm:$0xff]   ;;  %v2435_v18 = vld [vmem:[%s3560_s3 + $0x198] ss:$12 sps:$4 sm:$0xff]   ;;  %v2436_v19 = vld [vmem:[%s3560_s3 + $0x1b4] ss:$12 sps:$4 sm:$0xff]   ;;  %v177_v23 = vstv %s2763_s20 }
  0x23   :  { %518 = vmatprep.subr.bf16.mxu1 %v2658_v1  ;;  %477 = vmatprep.subr.bf16.mxu0 %v2420_v7  ;;  %s2789_s14 = sld [smem:[#allocation2 + $0x83]]  ;;  %v2438_v20 = vld [vmem:[%s3560_s3 + $0x1b8] ss:$12 sps:$4 sm:$0xff]   ;;  %s2794_s17 = sld [smem:[#allocation2 + $0x84]]  ;;  %v2439_v21 = vld [vmem:[%s3560_s3 + $0x1b0] ss:$12 sps:$4 sm:$0xff]  }
  0x24   :  { %s2800_s18 = sld [smem:[#allocation2 + $0x85]]  ;;  %v2440_v22 = vld [vmem:[%s3560_s3 + $0x1cc] ss:$12 sps:$4 sm:$0xff]   ;;  %v2442_v26 = vld [vmem:[%s3560_s3 + $0x1d0] ss:$12 sps:$4 sm:$0xff]   ;;  %s2855_s21 = sld [smem:[#allocation2 + $0x86]] }
  0x25   :  { %v2443_v27 = vld [vmem:[%s3560_s3 + $0x1c8] ss:$12 sps:$4 sm:$0xff]   ;;  %v2818_v28 = vld [vmem:[%s3557_s0] sm:$0xf]  ;;  %v2823_v29 = vld [vmem:[%s3557_s0 + $0x4] sm:$0xf] }
  0x26   :  { %519 = vmatpush1.bf16.msra.mxu1 %v2422_v8  ;;  %478 = vmatpush1.bf16.msra.mxu0 %v2423_v9  ;;  %v2828_v30 = vld [vmem:[%s3557_s0 + $0x8] sm:$0xf]  ;;  %v2444_v32 = vld [vmem:[%s3560_s3 + $0x1e4] ss:$12 sps:$4 sm:$0xff]   ;;  %v2837_v33 = vld [vmem:[%s3557_s0 + $0xc] sm:$0xf]  ;;  %v178_v34 = vmul.f32 %v177_v23, %v2818_v28 }
  0x27   :  { %520 = vmatprep.subr.bf16.mxu1 %v2658_v1  ;;  %479 = vmatprep.subr.bf16.mxu0 %v2424_v10  ;;  %v180_v24 = vstv %s2772_s25  ;;  %v184_v25 = vstv %s2780_s30  ;;  %v2446_v37 = vld [vmem:[%s3560_s3 + $0x1e8] ss:$12 sps:$4 sm:$0xff]   ;;  %v2447_v38 = vld [vmem:[%s3560_s3 + $0x1e0] ss:$12 sps:$4 sm:$0xff]   ;;  %s2857_s22 = sld [smem:[#allocation2 + $0x87]]  ;;  %s2878_s30 = sld [smem:[#allocation2]] }
  0x28   :  { %v181_v35 = vmul.f32 %v2823_v29, %v180_v24  ;;  %v185_v36 = vmul.f32 %v2828_v30, %v184_v25  ;;  %v2851_v39 = vld [vmem:[%s3557_s0 + $0x10] sm:$0xf]  ;;  %v2448_v43 = vld [vmem:[%s3560_s3 + $0x1fc] ss:$12 sps:$4 sm:$0xff]   ;;  %v2866_v44 = vld [vmem:[%s3557_s0 + $0x14] sm:$0xf] }
  0x29   :  { %v188_v31 = vstv %s2789_s14  ;;  %v192_v40 = vstv %s2794_s17  ;;  %s2869_s17 = sld [smem:[#allocation2 + $0x88]]  ;;  %v2450_v46 = vld [vmem:[%s3560_s3 + $0x200] ss:$12 sps:$4 sm:$0xff]   ;;  %v2451_v49 = vld [vmem:[%s3560_s3 + $0x1f8] ss:$12 sps:$4 sm:$0xff]   ;;  %s2892_s13 = sld [smem:[#allocation5 + $0x1]] }
  0x2a   :  { %521 = vmatpush1.bf16.msra.mxu1 %v2426_v11  ;;  %480 = vmatpush1.bf16.msra.mxu0 %v2427_v12  ;;  %v182_v41 = vadd.f32 %v181_v35, %v178_v34  ;;  %v189_v42 = vmul.f32 %v2837_v33, %v188_v31  ;;  %v196_v45 = vstv %s2800_s18  ;;  %v193_v48 = vmul.f32 %v2851_v39, %v192_v40  ;;  %v2883_v50 = vld [vmem:[%s3557_s0 + $0x18] sm:$0xf]  ;;  %v2888_v51 = vld [vmem:[%s3557_s0 + $0x1c] sm:$0xf]  ;;  %v2452_v55 = vld [vmem:[%s3560_s3 + $0x214] ss:$12 sps:$4 sm:$0xff]  }
  0x2b   :  { %522 = vmatprep.subr.bf16.mxu1 %v2658_v1  ;;  %481 = vmatprep.subr.bf16.mxu0 %v2428_v13  ;;  %v197_v53 = vmul.f32 %v2866_v44, %v196_v45  ;;  %v200_v57 = vstv %s2855_s21  ;;  %s2899_s14 = sld [smem:[#allocation2 + $0x1]]  ;;  %v2904_v59 = vld [vmem:[%s3557_s0 + $0x20] sm:$0xf]  ;;  %s2908_s19 = sld [smem:[#allocation2 + $0x2]]  ;;  %v2454_v62 = vld [vmem:[%s3560_s3 + $0x218] ss:$12 sps:$4 sm:$0xff]  }
  0x2c   :  { %v186_v47 = vadd.f32 %v185_v36, %v182_v41  ;;  %v201_v60 = vmul.f32 %v2883_v50, %v200_v57  ;;  %v2659_v63 = vmov 1983009808   ;;  %v2455_v4 = vld [vmem:[%s3560_s3 + $0x210] ss:$12 sps:$4 sm:$0xff]   ;;  %v2918_v5 = vshrl.u32 %v119_v54, 7  ;;  %s1919_s28 = sld [smem:[#allocation2 + $0x3]] }
  0x2d   :  { %v204_v58 = vstv %s2857_s22  ;;  %v117_v0 = vunpack.c.l.s4 %v2659_v63  ;;  %v77_v6 = vstv %s2878_s30  ;;  %v2456_v7 = vld [vmem:[%s3560_s3 + $0x22c] ss:$12 sps:$4 sm:$0xff]   ;;  %v2458_v10 = vld [vmem:[%s3560_s3 + $0x230] ss:$12 sps:$4 sm:$0xff]   ;;  %s1920_s29 = sld [smem:[#allocation2 + $0x4]]  ;;  %s1921_s10 = sld [smem:[#allocation2 + $0x5]] }
  0x2e   :  { %523 = vmatpush1.bf16.msra.mxu1 %v2430_v14  ;;  %482 = vmatpush1.bf16.msra.mxu0 %v2431_v15  ;;  %v190_v52 = vadd.f32 %v189_v42, %v186_v47  ;;  %v205_v3 = vmul.f32 %v2888_v51, %v204_v58  ;;  %v78_v11 = vmul.f32 %v77_v6, %v2818_v28  ;;  %v2459_v12 = vld [vmem:[%s3560_s3 + $0x228] ss:$12 sps:$4 sm:$0xff]   ;;  %vm469_vm0 = vcmask 523264   ;;  %v2460_v40 = vld [vmem:[%s3560_s3] ss:$12 sps:$4 sm:$0xff]   ;;  %s1922_s1 = sld [smem:[#allocation2 + $0x6]] }
  0x2f   :  { %524 = vmatprep.subr.bf16.mxu1 %v2658_v1  ;;  %483 = vmatprep.subr.bf16.mxu0 %v2432_v16  ;;  %v208_v61 = vstv %s2869_s17  ;;  %v118_v13 = vunpack.c.0.s8 %v117_v0  ;;  %v212_v16 = vstv %s2892_s13  ;;  %v2463_v42 = vld [vmem:[%s3560_s3 + $0x8] ss:$12 sps:$4 sm:$0xff]   ;;  %s1923_s2 = sld [smem:[#allocation2 + $0x7]]  ;;  %s1924_s26 = sld [smem:[#allocation2 + $0x8]]  ;;  %v2468_v54 = vld [vmem:[%s3560_s3 + $0x30] ss:$12 sps:$4 sm:$0xff]  }
  0x30   :  { %v194_v56 = vadd.f32 %v193_v48, %v190_v52  ;;  %v209_v9 = vmul.f32 %v2904_v59, %v208_v61  ;;  %v2464_v48 = vld [vmem:[%s3560_s3 + $0x18] ss:$12 sps:$4 sm:$0xff]   ;;  %v2470_v52 = vld [vmem:[%s3560_s3 + $0x34] ss:$12 sps:$4 sm:$0xff]   ;;  %s2970_s27 = sld [smem:[#allocation5]]  ;;  %s2065_s24 = sld [smem:[#allocation2 + $0x106]] }
  0x31   :  { %v80_v15 = vstv %s2899_s14  ;;  %v2942_v23 = vsub.s32 %v118_v13, %v2918_v5  ;;  %v2474_v58 = vld [vmem:[%s3560_s3 + $0x4c] ss:$12 sps:$4 sm:$0xff]   ;;  %v2472_v63 = vld [vmem:[%s3560_s3 + $0x48] ss:$12 sps:$4 sm:$0xff]   ;;  %v2478_v6 = vld [vmem:[%s3560_s3 + $0x64] ss:$12 sps:$4 sm:$0xff]  }
  0x32   :  { %525 = vmatpush1.bf16.msra.mxu1 %v2434_v17  ;;  %484 = vmatpush1.bf16.msra.mxu0 %v2435_v18  ;;  %v198_v2 = vadd.f32 %v197_v53, %v194_v56  ;;  %v81_v17 = vmul.f32 %v2823_v29, %v80_v15  ;;  %v84_v18 = vstv %s2908_s19  ;;  %v88_v25 = vstv %s1919_s28  ;;  %v2471_v56 = vld [vmem:[%s3560_s3 + $0x38] ss:$12 sps:$4 sm:$0xff]   ;;  %s2060_s14 = sld [smem:[#allocation2 + $0x101]]  ;;  %v2482_v13 = vld [vmem:[%s3560_s3 + $0x7c] ss:$12 sps:$4 sm:$0xff]   ;;  %s2062_s28 = sld [smem:[#allocation2 + $0x103]] }
  0x33   :  { %526 = vmatprep.subr.bf16.mxu1 %v2658_v1  ;;  %485 = vmatprep.subr.bf16.mxu0 %v2436_v19  ;;  %v89_v31 = vmul.f32 %v2837_v33, %v88_v25  ;;  %s2067_s20 = sld [smem:[#allocation2 + $0x108]]  ;;  %s2156_s15 = sld [smem:[#allocation2 + $0x181]]  ;;  %vm2661_vm1 = vmmov 0   ;;  %vm1817_vm2 = vcmask 64512   ;;  %vm1891_vm3 = vcmask 33792  }
  0x34   :  { %v202_v8 = vadd.f32 %v201_v60, %v198_v2  ;;  %v2475_v2 = vld [vmem:[%s3560_s3 + $0x50] ss:$12 sps:$4 sm:$0xff]   ;;  %s2155_s13 = sld [smem:[#allocation2 + $0x180]]  ;;  %s3081_s19 = sld [smem:[#allocation2 + $0x182]] }
  0x35   :  { %v104_v60 = vstv %s1923_s2  ;;  %v108_v0 = vstv %s1924_s26  ;;  %s3092_s22 = sld [smem:[#allocation2 + $0x183]]  ;;  %s3124_s12 = sld [smem:[#allocation2 + $0x185]] }
  0x36   :  { %527 = vmatpush1.bf16.msra.mxu1 %v2438_v20  ;;  %486 = vmatpush1.bf16.msra.mxu0 %v2439_v21  ;;  %v206_v14 = vadd.f32 %v205_v3, %v202_v8  ;;  %v2462_v20 = vld [vmem:[%s3560_s3 + $0x4] ss:$12 sps:$4 sm:$0xff]   ;;  %v85_v21 = vmul.f32 %v2828_v30, %v84_v18  ;;  %v2483_v18 = vld [vmem:[%s3560_s3 + $0x80] ss:$12 sps:$4 sm:$0xff]   ;;  %s2161_s21 = sld [smem:[#allocation2 + $0x186]]  ;;  %s2163_s18 = sld [smem:[#allocation2 + $0x188]] }
  0x37   :  { %528 = vmatprep.subr.bf16.mxu1 %v2658_v1  ;;  %487 = vmatprep.subr.bf16.mxu0 %v2440_v22  ;;  %v82_v22 = vadd.f32 %v81_v17, %v78_v11  ;;  %v2479_v11 = vld [vmem:[%s3560_s3 + $0x68] ss:$12 sps:$4 sm:$0xff]   ;;  %s2164_s0 = sld [smem:[#allocation5 + $0x3]] }
  0x38   :  { %v210_v19 = vadd.f32 %v209_v9, %v206_v14  ;;  %v834_v17 = vstv %s2060_s14  ;;  %s2064_s14 = sld [smem:[#allocation2 + $0x105]] }
  0x3a   :  { %529 = vmatpush1.bf16.msra.mxu1 %v2442_v26  ;;  %488 = vmatpush1.bf16.msra.mxu0 %v2443_v27  ;;  %v213_v24 = vadd.f32 %v212_v16, %v210_v19  ;;  %v86_v27 = vadd.f32 %v85_v21, %v82_v22  ;;  %v2480_v16 = vld [vmem:[%s3560_s3 + $0x78] ss:$12 sps:$4 sm:$0xff]   ;;  %v2486_v21 = vld [vmem:[%s3560_s3 + $0x94] ss:$12 sps:$4 sm:$0xff]  }
  0x3b   :  { %530 = vmatprep.subr.bf16.mxu1 %v2658_v1  ;;  %489 = vmatprep.subr.bf16.mxu0 %v2444_v32  ;;  %v92_v32 = vstv %s1920_s29  ;;  %s2979_s29 = sld [smem:[#allocation2 + $0x100]] }
  0x3c   :  { %v214_v26 = vmax.f32 %v213_v24, 0.0  ;;  %v90_v36 = vadd.f32 %v89_v31, %v86_v27  ;;  %v2484_v27 = vld [vmem:[%s3560_s3 + $0x90] ss:$12 sps:$4 sm:$0xff]   ;;  %v2487_v31 = vld [vmem:[%s3560_s3 + $0x98] ss:$12 sps:$4 sm:$0xff]  }
  0x3e   :  { %531 = vmatpush1.bf16.msra.mxu1 %v2446_v37  ;;  %490 = vmatpush1.bf16.msra.mxu0 %v2447_v38  ;;  %v222_v34 = vrot.slane %v214_v26, %v2942_v23  ;;  %v93_v37 = vmul.f32 %v2851_v39, %v92_v32 }
  0x3f   :  { %532 = vmatprep.subr.bf16.mxu1 %v2658_v1  ;;  %491 = vmatprep.subr.bf16.mxu0 %v2448_v43  ;;  %v2466_v43 = vld [vmem:[%s3560_s3 + $0x1c] ss:$12 sps:$4 sm:$0xff]  }
  0x40   :  { %v223_v35 = vcombine.high %v222_v34, %v222_v34  ;;  %v226_v38 = vpack.c.bf16 %v222_v34, %v222_v34  ;;  %v94_v45 = vadd.f32 %v93_v37, %v90_v36  ;;  %v2490_v34 = vld [vmem:[%s3560_s3 + $0xac] ss:$12 sps:$4 sm:$0xff]   ;;  %v842_v36 = vstv %s2062_s28  ;;  %v2488_v37 = vld [vmem:[%s3560_s3 + $0xa8] ss:$12 sps:$4 sm:$0xff]   ;;  %s2066_s28 = sld [smem:[#allocation2 + $0x107]] }
  0x41   :  { %v831_v9 = vstv %s2979_s29  ;;  %s2063_s29 = sld [smem:[#allocation2 + $0x104]] }
  0x42   :  { %533 = vmatpush1.bf16.msra.mxu1 %v2450_v46  ;;  %492 = vmatpush1.bf16.msra.mxu0 %v2451_v49  ;;  %v227_v41 = vpack.c.bf16 %v223_v35, %v223_v35  ;;  %v96_v46 = vstv %s1921_s10  ;;  %v2467_v49 = vld [vmem:[%s3560_s3 + $0x20] ss:$12 sps:$4 sm:$0xff]   ;;  %v832_v15 = vmul.f32 %v831_v9, %v2818_v28  ;;  %s3069_s10 = sld [smem:[#allocation5 + $0x2]]  ;;  %v1211_v9 = vstv %s2155_s13 }
  0x43   :  { %534 = vmatprep.subr.bf16.mxu1 %v2658_v1  ;;  %493 = vmatprep.subr.bf16.mxu0 %v2452_v55  ;;  %v97_v47 = vmul.f32 %v2866_v44, %v96_v46  ;;  %v100_v55 = vstv %s1922_s1  ;;  %s2061_s1 = sld [smem:[#allocation2 + $0x102]]  ;;  %v2492_v46 = vld [vmem:[%s3560_s3 + $0xc0] ss:$12 sps:$4 sm:$0xff]  }
  0x44   :  { %2019 = vmatprep.mubr.msk.bf16.mxu0 %vm469_vm0, %v227_v41  ;;  %2020 = vmatprep.mubr.msk.bf16.mxu1 %vm469_vm0, %v227_v41  ;;  %v101_v57 = vmul.f32 %v2883_v50, %v100_v55  ;;  %v2499_v55 = vld [vmem:[%s3560_s3 + $0xe0] ss:$12 sps:$4 sm:$0xff]  }
  0x45   :  { %v98_v53 = vadd.f32 %v97_v47, %v94_v45  ;;  %v2495_v47 = vld [vmem:[%s3560_s3 + $0xc8] ss:$12 sps:$4 sm:$0xff]  }
  0x46   :  { %535 = vmatpush1.bf16.msra.mxu1 %v2454_v62  ;;  %494 = vmatpush1.bf16.msra.mxu0 %v2455_v4  ;;  %v105_v62 = vmul.f32 %v2888_v51, %v104_v60  ;;  %v109_v4 = vmul.f32 %v2904_v59, %v108_v0  ;;  %v2502_v60 = vld [vmem:[%s3560_s3 + $0xf4] ss:$12 sps:$4 sm:$0xff]   ;;  %v858_v0 = vstv %s2066_s28  ;;  %s2162_s28 = sld [smem:[#allocation2 + $0x187]] }
  0x47   :  { %536 = vmatprep.subr.bf16.mxu1 %v2658_v1  ;;  %495 = vmatprep.subr.bf16.mxu0 %v2456_v7  ;;  %v102_v61 = vadd.f32 %v101_v57, %v98_v53  ;;  %v112_v7 = vstv %s2970_s27  ;;  %v846_v41 = vstv %s2063_s29  ;;  %s3110_s29 = sld [smem:[#allocation2 + $0x184]] }
  0x48   :  { %v847_v45 = vmul.f32 %v2851_v39, %v846_v41 }
  0x49   :  { %v106_v3 = vadd.f32 %v105_v62, %v102_v61  ;;  %v838_v22 = vstv %s2061_s1  ;;  %v2500_v62 = vld [vmem:[%s3560_s3 + $0xf0] ss:$12 sps:$4 sm:$0xff]  }
  0x4a   :  { %537 = vmatpush1.bf16.msra.mxu1 %v2458_v10  ;;  %496 = vmatpush1.bf16.msra.mxu0 %v2459_v12  ;;  %v2476_v10 = vld [vmem:[%s3560_s3 + $0x60] ss:$12 sps:$4 sm:$0xff]   ;;  %v839_v26 = vmul.f32 %v2828_v30, %v838_v22 }
  0x4b   :  { %790 = vmatprep.subr.bf16.mxu1 %v2658_v1  ;;  %749 = vmatprep.subr.bf16.mxu0 %v2462_v20  ;;  %v110_v8 = vadd.f32 %v109_v4, %v106_v3  ;;  %v835_v20 = vmul.f32 %v2823_v29, %v834_v17  ;;  %v2506_v3 = vld [vmem:[%s3560_s3 + $0x10c] ss:$12 sps:$4 sm:$0xff]   ;;  %v859_v4 = vmul.f32 %v2888_v51, %v858_v0 }
  0x4c   :  { %v2535_v0 = vld [vmem:[%s3560_s3 + $0x2d8] ss:$12 sps:$4 sm:$0xff]  }
  0x4d   :  { %506 = vmatmul.mubr.bf16.vlgmr.msra.gmra.mrb[0].mxu0 %v226_v38  ;;  %547 = vmatmul.mubr.bf16.vlgmr.msra.gmra.mrb[0].mxu1 %v226_v38  ;;  %v113_v12 = vadd.f32 %v112_v7, %v110_v8  ;;  %v836_v25 = vadd.f32 %v835_v20, %v832_v15  ;;  %v843_v38 = vmul.f32 %v2837_v33, %v842_v36  ;;  %v2504_v7 = vld [vmem:[%s3560_s3 + $0x108] ss:$12 sps:$4 sm:$0xff]   ;;  %v2516_v36 = vld [vmem:[%s3560_s3 + $0x270] ss:$12 sps:$4 sm:$0xff]  }
  0x4e   :  { %791 = vmatpush1.bf16.msra.mxu1 %v2463_v42  ;;  %750 = vmatpush1.bf16.msra.mxu0 %v2460_v40  ;;  %v2491_v40 = vld [vmem:[%s3560_s3 + $0xb0] ss:$12 sps:$4 sm:$0xff]   ;;  %v1212_v15 = vmul.f32 %v1211_v9, %v2818_v28  ;;  %v2511_v28 = vld [vmem:[%s3560_s3 + $0x248] ss:$12 sps:$4 sm:$0xff]   ;;  %v1246_v9 = vstv %s2164_s0 }
  0x4f   :  { %792 = vmatprep.subr.bf16.mxu1 %v2658_v1  ;;  %751 = vmatprep.subr.bf16.mxu0 %v2466_v43  ;;  %v114_v14 = vmax.f32 %v113_v12, 0.0  ;;  %v840_v35 = vadd.f32 %v839_v26, %v836_v25  ;;  %v2494_v42 = vld [vmem:[%s3560_s3 + $0xc4] ss:$12 sps:$4 sm:$0xff]   ;;  %v1222_v26 = vstv %s3092_s22 }
  0x50   :  { %v2510_v12 = vld [vmem:[%s3560_s3 + $0x244] ss:$12 sps:$4 sm:$0xff]  }
  0x51   :  { %v3017_v19 = vrot.slane %v114_v14, %v2942_v23  ;;  %v844_v43 = vadd.f32 %v843_v38, %v840_v35  ;;  %v1214_v14 = vstv %s2156_s15  ;;  %v1223_v35 = vmul.f32 %v2837_v33, %v1222_v26  ;;  %v2522_v33 = vld [vmem:[%s3560_s3 + $0x28c] ss:$12 sps:$4 sm:$0xff]   ;;  %v2559_v26 = vld [vmem:[%s3560_s3 + $0x368] ss:$12 sps:$4 sm:$0xff]  }
  0x52   :  { %793 = vmatpush1.bf16.msra.mxu1 %v2467_v49  ;;  %752 = vmatpush1.bf16.msra.mxu0 %v2464_v48  ;;  %v2498_v49 = vld [vmem:[%s3560_s3 + $0xdc] ss:$12 sps:$4 sm:$0xff]   ;;  %v1226_v38 = vstv %s3110_s29 }
  0x53   :  { %794 = vmatprep.subr.bf16.mxu1 %v2658_v1  ;;  %753 = vmatprep.subr.bf16.mxu0 %v2470_v52  ;;  %v123_v24 = vcombine.high %v3017_v19, %v3017_v19  ;;  %v848_v48 = vadd.f32 %v847_v45, %v844_v43  ;;  %v850_v52 = vstv %s2064_s14  ;;  %v126_v17 = vpack.c.bf16 %v3017_v19, %v3017_v19  ;;  %v2520_v43 = vld [vmem:[%s3560_s3 + $0x288] ss:$12 sps:$4 sm:$0xff]  }
  0x54   :  { %v851_v53 = vmul.f32 %v2866_v44, %v850_v52  ;;  %v1230_v45 = vstv %s3124_s12  ;;  %v2524_v52 = vld [vmem:[%s3560_s3 + $0x2a0] ss:$12 sps:$4 sm:$0xff]  }
  0x55   :  { %v127_v32 = vpack.c.bf16 %v123_v24, %v123_v24 }
  0x56   :  { %795 = vmatpush1.bf16.msra.mxu1 %v2471_v56  ;;  %754 = vmatpush1.bf16.msra.mxu0 %v2468_v54  ;;  %v2496_v54 = vld [vmem:[%s3560_s3 + $0xd8] ss:$12 sps:$4 sm:$0xff]   ;;  %v854_v56 = vstv %s2065_s24  ;;  %v852_v57 = vadd.f32 %v851_v53, %v848_v48  ;;  %v1231_v48 = vmul.f32 %v2866_v44, %v1230_v45  ;;  %v2527_v53 = vld [vmem:[%s3560_s3 + $0x2a8] ss:$12 sps:$4 sm:$0xff]   ;;  %v2579_v45 = vld [vmem:[%s3560_s3 + $0x3e0] ss:$12 sps:$4 sm:$0xff]  }
  0x57   :  { %796 = vmatprep.subr.bf16.mxu1 %v2658_v1  ;;  %755 = vmatprep.subr.bf16.mxu0 %v2474_v58  ;;  %v855_v58 = vmul.f32 %v2883_v50, %v854_v56  ;;  %v1238_v56 = vstv %s2162_s28 }
  0x58   :  { %2058 = vmatprep.mubr.msk.bf16.mxu1 %vm469_vm0, %v127_v32  ;;  %2057 = vmatprep.mubr.msk.bf16.mxu0 %vm469_vm0, %v127_v32 }
  0x59   :  { %v856_v61 = vadd.f32 %v855_v58, %v852_v57  ;;  %v2528_v57 = vld [vmem:[%s3560_s3 + $0x2b8] ss:$12 sps:$4 sm:$0xff]   ;;  %v2531_v58 = vld [vmem:[%s3560_s3 + $0x2c0] ss:$12 sps:$4 sm:$0xff]  }
  0x5a   :  { %797 = vmatpush1.bf16.msra.mxu1 %v2475_v2  ;;  %756 = vmatpush1.bf16.msra.mxu0 %v2472_v63  ;;  %v2503_v63 = vld [vmem:[%s3560_s3 + $0xf8] ss:$12 sps:$4 sm:$0xff]   ;;  %v862_v2 = vstv %s2067_s20 }
  0x5b   :  { %798 = vmatprep.subr.bf16.mxu1 %v2658_v1  ;;  %757 = vmatprep.subr.bf16.mxu0 %v2478_v6  ;;  %v863_v6 = vmul.f32 %v2904_v59, %v862_v2  ;;  %v860_v8 = vadd.f32 %v859_v4, %v856_v61  ;;  %v2538_v2 = vld [vmem:[%s3560_s3 + $0x2ec] ss:$12 sps:$4 sm:$0xff]   ;;  %v2536_v4 = vld [vmem:[%s3560_s3 + $0x2e8] ss:$12 sps:$4 sm:$0xff]  }
  0x5e   :  { %799 = vmatpush1.bf16.msra.mxu1 %v2479_v11  ;;  %758 = vmatpush1.bf16.msra.mxu0 %v2476_v10  ;;  %v2507_v10 = vld [vmem:[%s3560_s3 + $0x110] ss:$12 sps:$4 sm:$0xff]   ;;  %v866_v11 = vstv %s3069_s10 }
  0x5f   :  { %800 = vmatprep.subr.bf16.mxu1 %v2658_v1  ;;  %759 = vmatprep.subr.bf16.mxu0 %v2482_v13  ;;  %v864_v13 = vadd.f32 %v863_v6, %v860_v8  ;;  %v2539_v6 = vld [vmem:[%s3560_s3 + $0x2f0] ss:$12 sps:$4 sm:$0xff]  }
  0x61   :  { %v867_v20 = vadd.f32 %v866_v11, %v864_v13  ;;  %v2546_v11 = vld [vmem:[%s3560_s3 + $0x31c] ss:$12 sps:$4 sm:$0xff]   ;;  %v2544_v13 = vld [vmem:[%s3560_s3 + $0x318] ss:$12 sps:$4 sm:$0xff]  }
  0x62   :  { %801 = vmatpush1.bf16.msra.mxu1 %v2483_v18  ;;  %760 = vmatpush1.bf16.msra.mxu0 %v2480_v16  ;;  %v1215_v16 = vmul.f32 %v2823_v29, %v1214_v14  ;;  %v2508_v18 = vld [vmem:[%s3560_s3 + $0x240] ss:$12 sps:$4 sm:$0xff]   ;;  %v2514_v29 = vld [vmem:[%s3560_s3 + $0x25c] ss:$12 sps:$4 sm:$0xff]  }
  0x63   :  { %802 = vmatprep.subr.bf16.mxu1 %v2658_v1  ;;  %761 = vmatprep.subr.bf16.mxu0 %v2486_v21  ;;  %v1218_v21 = vstv %s3081_s19  ;;  %v868_v19 = vmax.f32 %v867_v20, 0.0  ;;  %v2547_v14 = vld [vmem:[%s3560_s3 + $0x320] ss:$12 sps:$4 sm:$0xff]  }
  0x64   :  { %v1216_v22 = vadd.f32 %v1215_v16, %v1212_v15  ;;  %v1219_v24 = vmul.f32 %v2828_v30, %v1218_v21  ;;  %v2518_v30 = vld [vmem:[%s3560_s3 + $0x274] ss:$12 sps:$4 sm:$0xff]   ;;  %v2554_v20 = vld [vmem:[%s3560_s3 + $0x34c] ss:$12 sps:$4 sm:$0xff]  }
  0x65   :  { %v3121_v25 = vrot.slane %v868_v19, %v2942_v23  ;;  %v2550_v15 = vld [vmem:[%s3560_s3 + $0x334] ss:$12 sps:$4 sm:$0xff]   ;;  %v2558_v19 = vld [vmem:[%s3560_s3 + $0x364] ss:$12 sps:$4 sm:$0xff]  }
  0x66   :  { %803 = vmatpush1.bf16.msra.mxu1 %v2487_v31  ;;  %762 = vmatpush1.bf16.msra.mxu0 %v2484_v27  ;;  %v2512_v27 = vld [vmem:[%s3560_s3 + $0x258] ss:$12 sps:$4 sm:$0xff]   ;;  %v2515_v31 = vld [vmem:[%s3560_s3 + $0x260] ss:$12 sps:$4 sm:$0xff]  }
  0x67   :  { %804 = vmatprep.subr.bf16.mxu1 %v2658_v1  ;;  %763 = vmatprep.subr.bf16.mxu0 %v2490_v34  ;;  %v877_v32 = vcombine.high %v3121_v25, %v3121_v25  ;;  %v1220_v34 = vadd.f32 %v1219_v24, %v1216_v22  ;;  %v880_v22 = vpack.c.bf16 %v3121_v25, %v3121_v25  ;;  %v2556_v24 = vld [vmem:[%s3560_s3 + $0x360] ss:$12 sps:$4 sm:$0xff]   ;;  %v2560_v25 = vld [vmem:[%s3560_s3 + $0x378] ss:$12 sps:$4 sm:$0xff]  }
  0x69   :  { %v1224_v41 = vadd.f32 %v1223_v35, %v1220_v34  ;;  %v2564_v34 = vld [vmem:[%s3560_s3 + $0x390] ss:$12 sps:$4 sm:$0xff]   ;;  %v2567_v35 = vld [vmem:[%s3560_s3 + $0x398] ss:$12 sps:$4 sm:$0xff]  }
  0x6a   :  { %805 = vmatpush1.bf16.msra.mxu1 %v2491_v40  ;;  %764 = vmatpush1.bf16.msra.mxu0 %v2488_v37  ;;  %v881_v37 = vpack.c.bf16 %v877_v32, %v877_v32  ;;  %v2519_v40 = vld [vmem:[%s3560_s3 + $0x278] ss:$12 sps:$4 sm:$0xff]   ;;  %v2566_v32 = vld [vmem:[%s3560_s3 + $0x394] ss:$12 sps:$4 sm:$0xff]  }
  0x6b   :  { %806 = vmatprep.subr.bf16.mxu1 %v2658_v1  ;;  %765 = vmatprep.subr.bf16.mxu0 %v2494_v42  ;;  %v1227_v42 = vmul.f32 %v2851_v39, %v1226_v38  ;;  %v2571_v38 = vld [vmem:[%s3560_s3 + $0x3b0] ss:$12 sps:$4 sm:$0xff]  }
  0x6d   :  { %v1228_v39 = vadd.f32 %v1227_v42, %v1224_v41  ;;  %v2575_v41 = vld [vmem:[%s3560_s3 + $0x3c8] ss:$12 sps:$4 sm:$0xff]  }
  0x6e   :  { %807 = vmatpush1.bf16.msra.mxu1 %v2495_v47  ;;  %766 = vmatpush1.bf16.msra.mxu0 %v2492_v46  ;;  %v2523_v46 = vld [vmem:[%s3560_s3 + $0x290] ss:$12 sps:$4 sm:$0xff]  }
  0x6f   :  { %808 = vmatprep.subr.bf16.mxu1 %v2658_v1  ;;  %767 = vmatprep.subr.bf16.mxu0 %v2498_v49  ;;  %v2526_v47 = vld [vmem:[%s3560_s3 + $0x2a4] ss:$12 sps:$4 sm:$0xff]   ;;  %v1234_v49 = vstv %s2161_s21  ;;  %v1232_v44 = vadd.f32 %v1231_v48, %v1228_v39  ;;  %v2578_v42 = vld [vmem:[%s3560_s3 + $0x3dc] ss:$12 sps:$4 sm:$0xff]   ;;  %v2586_v48 = vld [vmem:[%s3560_s3 + $0x40c] ss:$12 sps:$4 sm:$0xff]  }
  0x70   :  { %v2583_v39 = vld [vmem:[%s3560_s3 + $0x3f8] ss:$12 sps:$4 sm:$0xff]  }
  0x72   :  { %809 = vmatpush1.bf16.msra.mxu1 %v2499_v55  ;;  %768 = vmatpush1.bf16.msra.mxu0 %v2496_v54  ;;  %v2530_v54 = vld [vmem:[%s3560_s3 + $0x2bc] ss:$12 sps:$4 sm:$0xff]   ;;  %v1235_v55 = vmul.f32 %v2883_v50, %v1234_v49  ;;  %v1239_v50 = vmul.f32 %v2888_v51, %v1238_v56  ;;  %v2592_v56 = vld [vmem:[%s3560_s3 + $0x438] ss:$12 sps:$4 sm:$0xff]  }
  0x73   :  { %810 = vmatprep.subr.bf16.mxu1 %v2658_v1  ;;  %769 = vmatprep.subr.bf16.mxu0 %v2502_v60  ;;  %v2534_v60 = vld [vmem:[%s3560_s3 + $0x2d4] ss:$12 sps:$4 sm:$0xff]  }
  0x74   :  { %v1236_v61 = vadd.f32 %v1235_v55, %v1232_v44  ;;  %v2584_v49 = vld [vmem:[%s3560_s3 + $0x408] ss:$12 sps:$4 sm:$0xff]  }
  0x75   :  { %v2591_v44 = vld [vmem:[%s3560_s3 + $0x428] ss:$12 sps:$4 sm:$0xff]  }
  0x76   :  { %811 = vmatpush1.bf16.msra.mxu1 %v2503_v63  ;;  %770 = vmatpush1.bf16.msra.mxu0 %v2500_v62  ;;  %v1242_v62 = vstv %s2163_s18  ;;  %v2532_v63 = vld [vmem:[%s3560_s3 + $0x2d0] ss:$12 sps:$4 sm:$0xff]   ;;  %v1240_v51 = vadd.f32 %v1239_v50, %v1236_v61  ;;  %v2599_v61 = vld [vmem:[%s3560_s3 + $0x458] ss:$12 sps:$4 sm:$0xff]  }
  0x77   :  { %812 = vmatprep.subr.bf16.mxu1 %v2658_v1  ;;  %771 = vmatprep.subr.bf16.mxu0 %v2506_v3  ;;  %v1243_v3 = vmul.f32 %v2904_v59, %v1242_v62  ;;  %v2540_v59 = vld [vmem:[%s3560_s3 + $0x300] ss:$12 sps:$4 sm:$0xff]   ;;  %v2594_v55 = vld [vmem:[%s3560_s3 + $0x43c] ss:$12 sps:$4 sm:$0xff]  }
  0x78   :  { %v2602_v50 = vld [vmem:[%s3560_s3 + $0x46c] ss:$12 sps:$4 sm:$0xff]   ;;  %v2600_v62 = vld [vmem:[%s3560_s3 + $0x468] ss:$12 sps:$4 sm:$0xff]  }
  0x79   :  { %v1244_v8 = vadd.f32 %v1243_v3, %v1240_v51  ;;  %v1646_v51 = vld [vmem:[%s3562_s5 + $0x108] sm:$0xff]  ;;  %v2660_v3 = vmov 0.0|0.0  }
  0x7a   :  { %813 = vmatpush1.bf16.msra.mxu1 %v2507_v10  ;;  %772 = vmatpush1.bf16.msra.mxu0 %v2504_v7  ;;  %v2542_v7 = vld [vmem:[%s3560_s3 + $0x304] ss:$12 sps:$4 sm:$0xff]   ;;  %v2543_v10 = vld [vmem:[%s3560_s3 + $0x308] ss:$12 sps:$4 sm:$0xff]  }
  0x7b   :  { %1167 = vmatprep.subr.bf16.mxu1 %v2658_v1  ;;  %1126 = vmatprep.subr.bf16.mxu0 %v2510_v12  ;;  %v1247_v12 = vadd.f32 %v1246_v9, %v1244_v8  ;;  %v1614_v8 = vld [vmem:[%s3562_s5 + $0x8] sm:$0xff] }
  0x7d   :  { %823 = vmatmul.mubr.bf16.vlgmr.msra.gmra.mrb[4].mxu1 %v126_v17  ;;  %782 = vmatmul.mubr.bf16.vlgmr.msra.gmra.mrb[4].mxu0 %v126_v17  ;;  %v1248_v16 = vmax.f32 %v1247_v12, 0.0  ;;  %v2548_v17 = vld [vmem:[%s3560_s3 + $0x330] ss:$12 sps:$4 sm:$0xff]  }
  0x7e   :  { %1168 = vmatpush1.bf16.msra.mxu1 %v2511_v28  ;;  %1127 = vmatpush1.bf16.msra.mxu0 %v2508_v18  ;;  %v2551_v18 = vld [vmem:[%s3560_s3 + $0x338] ss:$12 sps:$4 sm:$0xff]   ;;  %v2552_v28 = vld [vmem:[%s3560_s3 + $0x348] ss:$12 sps:$4 sm:$0xff]  }
  0x7f   :  { %1169 = vmatprep.subr.bf16.mxu1 %v2658_v1  ;;  %1128 = vmatprep.subr.bf16.mxu0 %v2514_v29  ;;  %v3239_v21 = vrot.slane %v1248_v16, %v2942_v23  ;;  %v2555_v29 = vld [vmem:[%s3560_s3 + $0x350] ss:$12 sps:$4 sm:$0xff]  }
  0x80   :  { %2154 = vmatprep.mubr.msk.bf16.mxu1 %vm469_vm0, %v881_v37  ;;  %2153 = vmatprep.mubr.msk.bf16.mxu0 %vm469_vm0, %v881_v37  ;;  %v2568_v37 = vld [vmem:[%s3560_s3 + $0x3a8] ss:$12 sps:$4 sm:$0xff]   ;;  %v1616_v16 = vld [vmem:[%s3562_s5 + $0x18] sm:$0xff] }
  0x81   :  { %v1257_v23 = vcombine.high %v3239_v21, %v3239_v21  ;;  %v1631_v12 = vld [vmem:[%s3562_s5 + $0x90] sm:$0xff] }
  0x82   :  { %1170 = vmatpush1.bf16.msra.mxu1 %v2515_v31  ;;  %1129 = vmatpush1.bf16.msra.mxu0 %v2512_v27  ;;  %v2562_v27 = vld [vmem:[%s3560_s3 + $0x37c] ss:$12 sps:$4 sm:$0xff]  }
  0x83   :  { %1171 = vmatprep.subr.bf16.mxu1 %v2658_v1  ;;  %1130 = vmatprep.subr.bf16.mxu0 %v2518_v30  ;;  %v1261_v31 = vpack.c.bf16 %v1257_v23, %v1257_v23  ;;  %v2563_v30 = vld [vmem:[%s3560_s3 + $0x380] ss:$12 sps:$4 sm:$0xff]  }
  0x84   :  { %v1617_v23 = vld [vmem:[%s3562_s5 + $0x20] sm:$0xff] }
  0x86   :  { %1172 = vmatpush1.bf16.msra.mxu1 %v2519_v40  ;;  %1131 = vmatpush1.bf16.msra.mxu0 %v2516_v36  ;;  %v2570_v36 = vld [vmem:[%s3560_s3 + $0x3ac] ss:$12 sps:$4 sm:$0xff]   ;;  %v2574_v40 = vld [vmem:[%s3560_s3 + $0x3c4] ss:$12 sps:$4 sm:$0xff]  }
  0x87   :  { %1173 = vmatprep.subr.bf16.mxu1 %v2658_v1  ;;  %1132 = vmatprep.subr.bf16.mxu0 %v2522_v33  ;;  %v2572_v33 = vld [vmem:[%s3560_s3 + $0x3c0] ss:$12 sps:$4 sm:$0xff]  }
  0x8a   :  { %1174 = vmatpush1.bf16.msra.mxu1 %v2523_v46  ;;  %1133 = vmatpush1.bf16.msra.mxu0 %v2520_v43  ;;  %v2576_v43 = vld [vmem:[%s3560_s3 + $0x3d8] ss:$12 sps:$4 sm:$0xff]   ;;  %v2582_v46 = vld [vmem:[%s3560_s3 + $0x3f4] ss:$12 sps:$4 sm:$0xff]  }
  0x8b   :  { %1175 = vmatprep.subr.bf16.mxu1 %v2658_v1  ;;  %1134 = vmatprep.subr.bf16.mxu0 %v2526_v47  ;;  %v2580_v47 = vld [vmem:[%s3560_s3 + $0x3f0] ss:$12 sps:$4 sm:$0xff]  }
  0x8e   :  { %1176 = vmatpush1.bf16.msra.mxu1 %v2527_v53  ;;  %1135 = vmatpush1.bf16.msra.mxu0 %v2524_v52  ;;  %v2587_v52 = vld [vmem:[%s3560_s3 + $0x410] ss:$12 sps:$4 sm:$0xff]  }
  0x8f   :  { %1177 = vmatprep.subr.bf16.mxu1 %v2658_v1  ;;  %1136 = vmatprep.subr.bf16.mxu0 %v2530_v54  ;;  %v2590_v53 = vld [vmem:[%s3560_s3 + $0x424] ss:$12 sps:$4 sm:$0xff]   ;;  %v2588_v54 = vld [vmem:[%s3560_s3 + $0x420] ss:$12 sps:$4 sm:$0xff]  }
  0x92   :  { %1178 = vmatpush1.bf16.msra.mxu1 %v2531_v58  ;;  %1137 = vmatpush1.bf16.msra.mxu0 %v2528_v57  ;;  %v2595_v57 = vld [vmem:[%s3560_s3 + $0x440] ss:$12 sps:$4 sm:$0xff]  }
  0x93   :  { %1179 = vmatprep.subr.bf16.mxu1 %v2658_v1  ;;  %1138 = vmatprep.subr.bf16.mxu0 %v2534_v60  ;;  %v2598_v58 = vld [vmem:[%s3560_s3 + $0x454] ss:$12 sps:$4 sm:$0xff]   ;;  %v2596_v60 = vld [vmem:[%s3560_s3 + $0x450] ss:$12 sps:$4 sm:$0xff]  }
  0x96   :  { %1180 = vmatpush1.bf16.msra.mxu1 %v2535_v0  ;;  %1139 = vmatpush1.bf16.msra.mxu0 %v2532_v63  ;;  %v2603_v63 = vld [vmem:[%s3560_s3 + $0x470] ss:$12 sps:$4 sm:$0xff]   ;;  %v1260_v0 = vpack.c.bf16 %v3239_v21, %v3239_v21  ;;  %v1633_v21 = vld [vmem:[%s3562_s5 + $0xa0] sm:$0xff] }
  0x97   :  { %1181 = vmatprep.subr.bf16.mxu1 %v2658_v1  ;;  %1140 = vmatprep.subr.bf16.mxu0 %v2538_v2  ;;  %v1645_v2 = vld [vmem:[%s3562_s5 + $0x100] sm:$0xff] }
  0x9a   :  { %1182 = vmatpush1.bf16.msra.mxu1 %v2539_v6  ;;  %1141 = vmatpush1.bf16.msra.mxu0 %v2536_v4  ;;  %v2381_v4 = vpack.c.bf16 %v1646_v51, %v1645_v2  ;;  %v1630_v6 = vld [vmem:[%s3562_s5 + $0x88] sm:$0xff]  ;;  %v1657_v2 = vld [vmem:[%s3562_s5 + $0x160] sm:$0xff] }
  0x9b   :  { %1183 = vmatprep.subr.bf16.mxu1 %v2658_v1  ;;  %1142 = vmatprep.subr.bf16.mxu0 %v2542_v7  ;;  %v1613_v7 = vld [vmem:[%s3562_s5] sm:$0xff]  ;;  %v1658_v51 = vld [vmem:[%s3562_s5 + $0x168] sm:$0xff] }
  0x9e   :  { %1184 = vmatpush1.bf16.msra.mxu1 %v2543_v10  ;;  %1143 = vmatpush1.bf16.msra.mxu0 %v2540_v59  ;;  %v2350_v59 = vpack.c.bf16 %v1614_v8, %v1613_v7  ;;  %v1647_v10 = vld [vmem:[%s3562_s5 + $0x110] sm:$0xff]  ;;  %v1625_v8 = vld [vmem:[%s3562_s5 + $0x60] sm:$0xff] }
  0x9f   :  { %1185 = vmatprep.subr.bf16.mxu1 %v2658_v1  ;;  %1144 = vmatprep.subr.bf16.mxu0 %v2546_v11  ;;  %v1648_v11 = vld [vmem:[%s3562_s5 + $0x118] sm:$0xff] }
  0xa2   :  { %1186 = vmatpush1.bf16.msra.mxu1 %v2547_v14  ;;  %1145 = vmatpush1.bf16.msra.mxu0 %v2544_v13  ;;  %v2384_v13 = vpack.c.bf16 %v1648_v11, %v1647_v10  ;;  %v1632_v14 = vld [vmem:[%s3562_s5 + $0x98] sm:$0xff]  ;;  %v1659_v10 = vld [vmem:[%s3562_s5 + $0x170] sm:$0xff] }
  0xa3   :  { %1187 = vmatprep.subr.bf16.mxu1 %v2658_v1  ;;  %1146 = vmatprep.subr.bf16.mxu0 %v2550_v15  ;;  %v1615_v15 = vld [vmem:[%s3562_s5 + $0x10] sm:$0xff]  ;;  %v1660_v11 = vld [vmem:[%s3562_s5 + $0x178] sm:$0xff] }
  0xa6   :  { %1188 = vmatpush1.bf16.msra.mxu1 %v2551_v18  ;;  %1147 = vmatpush1.bf16.msra.mxu0 %v2548_v17  ;;  %v2352_v17 = vpack.c.bf16 %v1632_v14, %v1631_v12  ;;  %v1649_v18 = vld [vmem:[%s3562_s5 + $0x120] sm:$0xff]  ;;  %v2402_v12 = vpack.c.bf16 %v1660_v11, %v1659_v10  ;;  %v1644_v14 = vld [vmem:[%s3562_s5 + $0xf8] sm:$0xff] }
  0xa7   :  { %1189 = vmatprep.subr.bf16.mxu1 %v2658_v1  ;;  %1148 = vmatprep.subr.bf16.mxu0 %v2554_v20  ;;  %v1650_v20 = vld [vmem:[%s3562_s5 + $0x128] sm:$0xff] }
  0xaa   :  { %1190 = vmatpush1.bf16.msra.mxu1 %v2555_v29  ;;  %1149 = vmatpush1.bf16.msra.mxu0 %v2552_v28  ;;  %v2354_v28 = vpack.c.bf16 %v1616_v16, %v1615_v15  ;;  %v1634_v29 = vld [vmem:[%s3562_s5 + $0xa8] sm:$0xff]  ;;  %v1627_v15 = vld [vmem:[%s3562_s5 + $0x70] sm:$0xff]  ;;  %v1628_v16 = vld [vmem:[%s3562_s5 + $0x78] sm:$0xff] }
  0xab   :  { %1547 = vmatprep.subr.bf16.mxu1 %v2658_v1  ;;  %1506 = vmatprep.subr.bf16.mxu0 %v2558_v19  ;;  %v2356_v19 = vpack.c.bf16 %v1634_v29, %v1633_v21 }
  0xad   :  { %1200 = vmatmul.mubr.bf16.vlgmr.msra.gmra.mrb[8].mxu1 %v880_v22  ;;  %1159 = vmatmul.mubr.bf16.vlgmr.msra.gmra.mrb[8].mxu0 %v880_v22  ;;  %v1618_v22 = vld [vmem:[%s3562_s5 + $0x28] sm:$0xff] }
  0xae   :  { %1548 = vmatpush1.bf16.msra.mxu1 %v2559_v26  ;;  %1507 = vmatpush1.bf16.msra.mxu0 %v2556_v24  ;;  %v2387_v24 = vpack.c.bf16 %v1650_v20, %v1649_v18  ;;  %v1635_v26 = vld [vmem:[%s3562_s5 + $0xb0] sm:$0xff]  ;;  %v2662_v18 = vmov 0.0  }
  0xaf   :  { %1549 = vmatprep.subr.bf16.mxu1 %v2658_v1  ;;  %1508 = vmatprep.subr.bf16.mxu0 %v2562_v27  ;;  %v1636_v27 = vld [vmem:[%s3562_s5 + $0xb8] sm:$0xff] }
  0xb0   :  { %2250 = vmatprep.mubr.msk.bf16.mxu1 %vm469_vm0, %v1261_v31  ;;  %2249 = vmatprep.mubr.msk.bf16.mxu0 %vm469_vm0, %v1261_v31  ;;  %v1651_v31 = vld [vmem:[%s3562_s5 + $0x130] sm:$0xff] }
  0xb2   :  { %1550 = vmatpush1.bf16.msra.mxu1 %v2563_v30  ;;  %1509 = vmatpush1.bf16.msra.mxu0 %v2560_v25  ;;  %v1652_v25 = vld [vmem:[%s3562_s5 + $0x138] sm:$0xff]  ;;  %v2358_v30 = vpack.c.bf16 %v1618_v22, %v1617_v23 }
  0xb3   :  { %1551 = vmatprep.subr.bf16.mxu1 %v2658_v1  ;;  %1510 = vmatprep.subr.bf16.mxu0 %v2566_v32  ;;  %v2360_v32 = vpack.c.bf16 %v1636_v27, %v1635_v26 }
  0xb6   :  { %1552 = vmatpush1.bf16.msra.mxu1 %v2567_v35  ;;  %1511 = vmatpush1.bf16.msra.mxu0 %v2564_v34  ;;  %v1619_v34 = vld [vmem:[%s3562_s5 + $0x30] sm:$0xff]  ;;  %v1620_v35 = vld [vmem:[%s3562_s5 + $0x38] sm:$0xff] }
  0xb7   :  { %1553 = vmatprep.subr.bf16.mxu1 %v2658_v1  ;;  %1512 = vmatprep.subr.bf16.mxu0 %v2570_v36  ;;  %v2390_v36 = vpack.c.bf16 %v1652_v25, %v1651_v31 }
  0xba   :  { %1554 = vmatpush1.bf16.msra.mxu1 %v2571_v38  ;;  %1513 = vmatpush1.bf16.msra.mxu0 %v2568_v37  ;;  %v1637_v37 = vld [vmem:[%s3562_s5 + $0xc0] sm:$0xff]  ;;  %v1638_v38 = vld [vmem:[%s3562_s5 + $0xc8] sm:$0xff] }
  0xbb   :  { %1555 = vmatprep.subr.bf16.mxu1 %v2658_v1  ;;  %1514 = vmatprep.subr.bf16.mxu0 %v2574_v40  ;;  %v1653_v40 = vld [vmem:[%s3562_s5 + $0x140] sm:$0xff] }
  0xbe   :  { %1556 = vmatpush1.bf16.msra.mxu1 %v2575_v41  ;;  %1515 = vmatpush1.bf16.msra.mxu0 %v2572_v33  ;;  %v1654_v33 = vld [vmem:[%s3562_s5 + $0x148] sm:$0xff]  ;;  %v2362_v41 = vpack.c.bf16 %v1620_v35, %v1619_v34 }
  0xbf   :  { %1557 = vmatprep.subr.bf16.mxu1 %v2658_v1  ;;  %1516 = vmatprep.subr.bf16.mxu0 %v2578_v42  ;;  %v2364_v42 = vpack.c.bf16 %v1638_v38, %v1637_v37 }
  0xc2   :  { %1558 = vmatpush1.bf16.msra.mxu1 %v2579_v45  ;;  %1517 = vmatpush1.bf16.msra.mxu0 %v2576_v43  ;;  %v1621_v43 = vld [vmem:[%s3562_s5 + $0x40] sm:$0xff]  ;;  %v1622_v45 = vld [vmem:[%s3562_s5 + $0x48] sm:$0xff] }
  0xc3   :  { %1559 = vmatprep.subr.bf16.mxu1 %v2658_v1  ;;  %1518 = vmatprep.subr.bf16.mxu0 %v2582_v46  ;;  %v2393_v46 = vpack.c.bf16 %v1654_v33, %v1653_v40 }
  0xc6   :  { %1560 = vmatpush1.bf16.msra.mxu1 %v2583_v39  ;;  %1519 = vmatpush1.bf16.msra.mxu0 %v2580_v47  ;;  %v1639_v47 = vld [vmem:[%s3562_s5 + $0xd0] sm:$0xff]  ;;  %v1640_v39 = vld [vmem:[%s3562_s5 + $0xd8] sm:$0xff] }
  0xc7   :  { %1561 = vmatprep.subr.bf16.mxu1 %v2658_v1  ;;  %1520 = vmatprep.subr.bf16.mxu0 %v2586_v48  ;;  %v1655_v48 = vld [vmem:[%s3562_s5 + $0x150] sm:$0xff] }
  0xca   :  { %1562 = vmatpush1.bf16.msra.mxu1 %v2587_v52  ;;  %1521 = vmatpush1.bf16.msra.mxu0 %v2584_v49  ;;  %v1656_v49 = vld [vmem:[%s3562_s5 + $0x158] sm:$0xff]  ;;  %v2366_v52 = vpack.c.bf16 %v1622_v45, %v1621_v43  ;;  %v1594_v43 = vsub.s32 0, %v2918_v5  ;;  %v1590_v45 = vld [vmem:[%s3561_s4] sm:$0x7] }
  0xcb   :  { %1563 = vmatprep.subr.bf16.mxu1 %v2658_v1  ;;  %1522 = vmatprep.subr.bf16.mxu0 %v2590_v53  ;;  %v2368_v53 = vpack.c.bf16 %v1640_v39, %v1639_v47 }
  0xcc   :  { %v1595_v39 = vrot.slane %v1590_v45, %v1594_v43 }
  0xce   :  { %1564 = vmatpush1.bf16.msra.mxu1 %v2591_v44  ;;  %1523 = vmatpush1.bf16.msra.mxu0 %v2588_v54  ;;  %v1623_v54 = vld [vmem:[%s3562_s5 + $0x50] sm:$0xff]  ;;  %v1624_v44 = vld [vmem:[%s3562_s5 + $0x58] sm:$0xff] }
  0xcf   :  { %1565 = vmatprep.subr.bf16.mxu1 %v2658_v1  ;;  %1524 = vmatprep.subr.bf16.mxu0 %v2594_v55  ;;  %v2396_v55 = vpack.c.bf16 %v1656_v49, %v1655_v48 }
  0xd2   :  { %1566 = vmatpush1.bf16.msra.mxu1 %v2595_v57  ;;  %1525 = vmatpush1.bf16.msra.mxu0 %v2592_v56  ;;  %v2370_v56 = vpack.c.bf16 %v1624_v44, %v1623_v54 }
  0xd3   :  { %1567 = vmatprep.subr.bf16.mxu1 %v2658_v1  ;;  %1526 = vmatprep.subr.bf16.mxu0 %v2598_v58 }
  0xd6   :  { %1568 = vmatpush1.bf16.msra.mxu1 %v2599_v61  ;;  %1527 = vmatpush1.bf16.msra.mxu0 %v2596_v60 }
  0xd7   :  { %1569 = vmatprep.subr.bf16.mxu1 %v2658_v1  ;;  %1528 = vmatprep.subr.bf16.mxu0 %v2602_v50  ;;  %v1629_v1 = vld [vmem:[%s3562_s5 + $0x80] sm:$0xff] }
  0xd8   :  { %v2348_v9 = vpack.c.bf16 %v1630_v6, %v1629_v1  ;;  %v2399_v1 = vpack.c.bf16 %v1658_v51, %v1657_v2  ;;  %v1642_v6 = vld [vmem:[%s3562_s5 + $0xe8] sm:$0xff]  ;;  %v1809_v51 = vld [vmem:[%s3564_s7] sm:$0xff]  ;;  %s2663_s7 = smov [#allocation7]  }
  0xd9   :  { %s1899_s11 = sshll.u32 %s2663_s7, 4  ;;  %s1900_s11 = int_to_ptr.vmem [resolvable:$true] %s1899_s11 }
  0xda   :  { %1570 = vmatpush1.bf16.msra.mxu1 %v2603_v63  ;;  %1529 = vmatpush1.bf16.msra.mxu0 %v2600_v62  ;;  %p2633_p11 = scmp.lt.s32.totalorder %s1900_s11, %s1900_s11 }
  0xdb   :  { %2380 = vmatprep.subr.bf16.mxu1 %v2660_v3  ;;  %2349 = vmatprep.subr.bf16.mxu0 %v2348_v9  ;;  %v1626_v9 = vld [vmem:[%s3562_s5 + $0x68] sm:$0xff] }
  0xdd   :  { %1580 = vmatmul.mubr.bf16.vlgmr.msra.gmra.mrb[12].mxu1 %v1260_v0  ;;  %1539 = vmatmul.mubr.bf16.vlgmr.msra.gmra.mrb[12].mxu0 %v1260_v0 }
  0xde   :  { %2382 = vmatpush3.bf16.msra.mxu1 %v2381_v4  ;;  %2351 = vmatpush3.bf16.msra.mxu0 %v2350_v59  ;;  %v1641_v4 = vld [vmem:[%s3562_s5 + $0xe0] sm:$0xff]  ;;  %v2374_v59 = vpack.c.bf16 %v1626_v9, %v1625_v8 }
  0xdf   :  { %2383 = vmatprep.subr.bf16.mxu1 %v2660_v3  ;;  %2353 = vmatprep.subr.bf16.mxu0 %v2352_v17  ;;  %v2372_v7 = vpack.c.bf16 %v1642_v6, %v1641_v4  ;;  %v2378_v17 = vpack.c.bf16 %v1628_v16, %v1627_v15 }
  0xe0   :  { %2340 = vmatprep.mubr.msk.f32.mxu1 %vm2661_vm1, %v2662_v18 }
  0xe2   :  { %2385 = vmatpush3.bf16.msra.mxu1 %v2384_v13  ;;  %2355 = vmatpush3.bf16.msra.mxu0 %v2354_v28  ;;  %v1643_v13 = vld [vmem:[%s3562_s5 + $0xf0] sm:$0xff] }
  0xe3   :  { %2386 = vmatprep.subr.bf16.mxu1 %v2660_v3  ;;  %2357 = vmatprep.subr.bf16.mxu0 %v2356_v19 }
  0xe6   :  { %2388 = vmatpush3.bf16.msra.mxu1 %v2387_v24  ;;  %2359 = vmatpush3.bf16.msra.mxu0 %v2358_v30 }
  0xe7   :  { %2389 = vmatprep.subr.bf16.mxu1 %v2660_v3  ;;  %2361 = vmatprep.subr.bf16.mxu0 %v2360_v32 }
  0xea   :  { %2391 = vmatpush3.bf16.msra.mxu1 %v2390_v36  ;;  %2363 = vmatpush3.bf16.msra.mxu0 %v2362_v41 }
  0xeb   :  { %2392 = vmatprep.subr.bf16.mxu1 %v2660_v3  ;;  %2365 = vmatprep.subr.bf16.mxu0 %v2364_v42  ;;  %v1602_v42 = vsub.s32 2, %v2918_v5 }
  0xed   :  { %v1603_v47 = vrot.slane %v1590_v45, %v1602_v42 }
  0xee   :  { %2394 = vmatpush3.bf16.msra.mxu1 %v2393_v46  ;;  %2367 = vmatpush3.bf16.msra.mxu0 %v2366_v52  ;;  %v1598_v46 = vsub.s32 1, %v2918_v5 }
  0xef   :  { %2395 = vmatprep.subr.bf16.mxu1 %v2660_v3  ;;  %2369 = vmatprep.subr.bf16.mxu0 %v2368_v53 }
  0xf0   :  { %v1599_v52 = vrot.slane %v1590_v45, %v1598_v46 }
  0xf2   :  { %2397 = vmatpush3.bf16.msra.mxu1 %v2396_v55  ;;  %2371 = vmatpush3.bf16.msra.mxu0 %v2370_v56 }
  0xf3   :  { %2398 = vmatprep.subr.bf16.mxu1 %v2660_v3  ;;  %2373 = vmatprep.subr.bf16.mxu0 %v2372_v7  ;;  %v2251_v7 = vld [vmem:[%s3563_s6] ss:$0 sm:$0xff]  ;;  %s2628_s6 = scalar_lea.vmem %s1900_s11, 32 }
  0xf4   :  { %p2629_p10 = scmp.ne.s32.totalorder %s1900_s11, %s2628_s6  ;;  %p2634_p12 = scmp.lt.s32.totalorder %s2628_s6, %s2628_s6 }
  0xf6   :  { %2400 = vmatpush3.bf16.msra.mxu1 %v2399_v1  ;;  %2375 = vmatpush3.bf16.msra.mxu0 %v2374_v59  ;;  %p2635_p13 = por %p2634_p12, %p2633_p11 }
  0xf7   :  { %2401 = vmatprep.subr.bf16.mxu1 %v2660_v3  ;;  %v2376_v3 = vpack.c.bf16 %v1644_v14, %v1643_v13 }
  0xf8   :  { %p2636_p0 = pnand %p2635_p13, %p2629_p10 }
  0xf9   :  { %2377 = vmatprep.subr.bf16.mxu0 %v2376_v3 }
  0xfa   :  { %2403 = vmatpush3.bf16.msra.mxu1 %v2402_v12  ;;  %2379 = vmatpush3.bf16.msra.mxu0 %v2378_v17  ;;  %v2252_v12 = vld [vmem:[%s3565_s8] ss:$0 sm:$0xff] }
  0xfb   :  { %2343 = vmatprep.subr.mxu0 %v2662_v18 }
 0x120   :  { %v507_v57 = vpop.f32.mrb[0].mxu0  ;;  %v548_v58 = vpop.f32.mrb[0].mxu1 }
 0x121   :  { %v509_v60 = vpop.f32.mrb[1].mxu0  ;;  %v550_v61 = vpop.f32.mrb[1].mxu1 }
 0x122   :  { %v511_v50 = vpop.f32.mrb[2].mxu0  ;;  %v551_v62 = vpop.f32.mrb[2].mxu1 }
 0x123   :  { %v512_v63 = vpop.f32.mrb[3].mxu0  ;;  %v552_v0 = vpop.f32.mrb[3].mxu1 }
 0x150   :  { %v824_v20 = vpop.f32.mrb[4].mxu1  ;;  %v783_v21 = vpop.f32.mrb[4].mxu0 }
 0x151   :  { %v825_v28 = vadd.f32 %v824_v20, %v548_v58  ;;  %v784_v29 = vadd.f32 %v783_v21, %v507_v57  ;;  %v785_v19 = vpop.f32.mrb[5].mxu0  ;;  %v826_v23 = vpop.f32.mrb[5].mxu1 }
 0x152   :  { %v786_v22 = vadd.f32 %v785_v19, %v509_v60  ;;  %v787_v24 = vpop.f32.mrb[6].mxu0  ;;  %v827_v26 = vpop.f32.mrb[6].mxu1 }
 0x153   :  { %v788_v27 = vpop.f32.mrb[7].mxu0  ;;  %v828_v31 = vpop.f32.mrb[7].mxu1 }
 0x180   :  { %v1201_v25 = vpop.f32.mrb[8].mxu1  ;;  %v1160_v30 = vpop.f32.mrb[8].mxu0 }
 0x181   :  { %v1209_v32 = vadd.f32 %v1201_v25, %v825_v28  ;;  %v1207_v34 = vadd.f32 %v1160_v30, %v784_v29  ;;  %v1162_v35 = vpop.f32.mrb[9].mxu0  ;;  %v1203_v36 = vpop.f32.mrb[9].mxu1 }
 0x182   :  { %v1208_v37 = vadd.f32 %v1162_v35, %v786_v22  ;;  %v1164_v38 = vpop.f32.mrb[10].mxu0  ;;  %v1204_v40 = vpop.f32.mrb[10].mxu1 }
 0x183   :  { %v1165_v33 = vpop.f32.mrb[11].mxu0  ;;  %v1205_v41 = vpop.f32.mrb[11].mxu1 }
 0x1b0   :  { %v1581_v48 = vpop.f32.mrb[12].mxu1  ;;  %v1540_v49 = vpop.f32.mrb[12].mxu0 }
 0x1b1   :  { %v1589_v53 = vadd.f32 %v1581_v48, %v1209_v32  ;;  %v1587_v54 = vadd.f32 %v1540_v49, %v1207_v34  ;;  %v1542_v44 = vpop.f32.mrb[13].mxu0  ;;  %v1583_v55 = vpop.f32.mrb[13].mxu1 }
 0x1b2   :  { %v1588_v56 = vadd.f32 %v1542_v44, %v1208_v37  ;;  %v1544_v57 = vpop.f32.mrb[14].mxu0  ;;  %v1584_v58 = vpop.f32.mrb[14].mxu1 }
 0x1b3   :  { %v1609_v60 = vadd.f32 %v1603_v47, %v1589_v53  ;;  %v1607_v61 = vadd.f32 %v1595_v39, %v1587_v54  ;;  %v1545_v50 = vpop.f32.mrb[15].mxu0  ;;  %v1585_v62 = vpop.f32.mrb[15].mxu1 }
 0x1b4   :  { %v1608_v63 = vadd.f32 %v1599_v52, %v1588_v56 }
 0x1b5   :  { %v1612_v0 = vmax.f32 %v1609_v60, 0.0  ;;  %v1610_v5 = vmax.f32 %v1607_v61, 0.0 }
 0x1b6   :  { %v1611_v2 = vmax.f32 %v1608_v63, 0.0 }
 0x1b7   :  { %2341 = vmatmul.mubr.f32.vlgmr.msra.gmra.mrb[16].mxu1 %v1612_v0 }
 0x1b8   :  { %1732 = vmatprep.mubr.f32.mxu0 %v1611_v2 }
 0x1b9   :  { %1733 = vmatmul.mubr.f32.vlgmr.msra.gmra.mrb[16].mxu0 %v1610_v5 }
 0x1ba   :  { %2345 = vmatprep.mubr.msk.f32.mxu0 %vm2661_vm1, %v2662_v18  ;;  %2344 = vmatpush3.msra.mxu0 %v1809_v51 }
 0x28a   :  { %v1804_v1 = vpop.f32.mrb[16].mxu1 }
 0x28b   :  { %v2342_v4 = vpop.f32.mrb[17].mxu1 }
 0x28c   :  { %v2286_v6 = vpop.f32.mrb[16].mxu0 }
 0x28d   :  { %v2287_v8 = vpop.f32.mrb[17].mxu0 }
 0x28e   :  { %v2288_v9 = vadd.f32 %v2287_v8, %v2286_v6 }
 0x290   :  { %v1735_v59 = vadd.f32 %v2288_v9, %v2251_v7 }
 0x292   :  { %v1805_v10 = vadd.f32 %v1804_v1, %v1735_v59 }
 0x294   :  { %v1808_v11 = vmax.f32 %v1805_v10, 0.0 }
 0x296   :  { %2346 = vmatmul.mubr.msk.f32.vlgmr.msra.gmra.mrb[18].mxu0 %vm1817_vm2, %v1808_v11 }
 0x369   :  { %v1887_v13 = vpop.f32.mrb[18].mxu0 }
 0x36a   :  { %v1888_v14 = vadd.f32 %v2252_v12, %v1887_v13  ;;  %v2347_v3 = vpop.f32.mrb[19].mxu0 }
 0x36c   :  { %1892 = vst.msk [vmem:[#allocation7] sm:$0x3] %vm1891_vm3, %v1888_v14 }
 0x36d   :  { %2639 = shalt.err (!%p2636_p0)
}
 0x36e   :  { %s2640_s3 = scalar_lea.hbm %s3566_s9, 32 }
 0x36f   :  { %p2641_p1 = scmp.ne.s32.totalorder %s3566_s9, %s2640_s3  ;;  %p2644_p2 = scmp.lt.u32.totalorder %s2640_s3, %s3566_s9 }
 0x371   :  { %p2646_p3 = pnand %p2644_p2, %p2641_p1 }
 0x373   :  { %2649 = shalt.err (!%p2646_p3)
}
 0x374   :  { %1902 = dma.vmem_to_hbm [thread:$0]  %s1900_s11, 32, %s3566_s9, [#allocation3]  }
 0x375   :  { %2654 = dma.done.wait [#allocation3], 32  }
 0x376   :  { %2655 = vsyncadd [#allocation3], 4294967264 }
 0x377   :  { %1906 = vsyncpa [#allocation3], 1 }
 0x378   :  { %1907 = vsyncpa [#allocation4], 1 }
 0x379   :  { %1908 = vsyncpa [#allocation6], 1 }

</bundles_post_ra>
